<compile_context>
chip_gen: v7x
topology: tpu7x:2x2x1
jax: 0.10.0
libtpu: 0.0.40
codegen_flags: <defaults>
</compile_context>

<pallas_src>
import math

import jax
import jax.numpy as jnp
from jax.experimental import pallas as pl
from jax.experimental.pallas import tpu as pltpu

# Small, module-consistent sizes.
B, P, E, H, FF = 2, 8, 32, 4, 64     # batch, no_patches, embed_dim, heads, dim_ff
HD = E // H                          # head dim
G = B * H                            # attention groups, g = b*H + h
EPS = 1e-5                           # BatchNorm eps (PyTorch default)
SCALE = 1.0 / math.sqrt(2 * HD)      # tupe_product scaling 1/sqrt(2*d)


def encoder_block_kernel(x_ref, pe_ref, per_ref, wstk_ref, w1_ref, w2_ref,
                         ffb_ref, bnp_ref, out_ref):
    x2 = x_ref[...]                                  # [B*P, E]
    pe2 = pe_ref[...]                                # [B*P, E]

    # ---- group-batched operands (g = b*H + h): only leading-dim reshapes /
    #      broadcasts, which are layout-cheap and robust on TPU. --------------
    x3 = x2.reshape(B, P, E)
    pe3 = pe2.reshape(B, P, E)
    xg = jnp.broadcast_to(x3[:, None, :, :], (B, H, P, E)).reshape(G, P, E)
    pg = jnp.broadcast_to(pe3[:, None, :, :], (B, H, P, E)).reshape(G, P, E)

    # ---- per-group projections; weights pre-stacked [G, HD, E] at init ------
    q = jnp.einsum('gpe,ghe->gph', xg, wstk_ref[0],
                   preferred_element_type=jnp.float32)
    k = jnp.einsum('gpe,ghe->gph', xg, wstk_ref[1],
                   preferred_element_type=jnp.float32)
    v = jnp.einsum('gpe,ghe->gph', xg, wstk_ref[2],
                   preferred_element_type=jnp.float32)
    uq = jnp.einsum('gpe,ghe->gph', pg, wstk_ref[3],
                    preferred_element_type=jnp.float32)
    uk = jnp.einsum('gpe,ghe->gph', pg, wstk_ref[4],
                    preferred_element_type=jnp.float32)

    # ---- TUPE logits: (q.k + uq.uk)/sqrt(2d) + PE_r, block-local per (b,h) --
    logits = (jnp.einsum('gqc,gkc->gqk', q, k, preferred_element_type=jnp.float32)
              + jnp.einsum('gqc,gkc->gqk', uq, uk, preferred_element_type=jnp.float32)
              ) * SCALE + per_ref[...]
    logits = logits - jnp.max(logits, axis=-1, keepdims=True)
    pexp = jnp.exp(logits)
    attn = pexp * pl.reciprocal(jnp.sum(pexp, axis=-1, keepdims=True), approx=True)
    vals = jnp.einsum('gqk,gkc->gqc', attn, v,
                      preferred_element_type=jnp.float32)          # [G, P, HD]

    # ---- Wo applied per head, heads reduced with a leading-axis sum: no
    #      lane relayout of the head-concatenated values is ever formed. ------
    og = jnp.einsum('gpc,gce->gpe', vals, wstk_ref[5],
                    preferred_element_type=jnp.float32)             # [G, P, E]
    attn_out = jnp.sum(og.reshape(B, H, P, E), axis=1).reshape(B * P, E)

    y = x2 + attn_out                                # dropout(p=0.0) == identity

    # ---- BatchNorm1d(no_patches): per-patch stats over (B, E), training-mode
    #      batch statistics with biased variance, two-pass for stability. -----
    def batch_norm(y2d, gamma, beta):                # gamma/beta: [P, 1]
        y3 = y2d.reshape(B, P, E)
        mean_p = jnp.mean(jnp.mean(y3, axis=2, keepdims=True),
                          axis=0, keepdims=True)                    # [1, P, 1]
        cen = y3 - mean_p
        var_p = jnp.mean(jnp.mean(cen * cen, axis=2, keepdims=True),
                         axis=0, keepdims=True)                     # [1, P, 1]
        inv = jax.lax.rsqrt(var_p + EPS)
        out = cen * (inv * gamma[None, :, :]) + beta[None, :, :]
        return out.reshape(B * P, E)

    bnp = bnp_ref[...]                               # [P, 4] = [g1|be1|g2|be2]
    y = batch_norm(y, bnp[:, 0:1], bnp[:, 1:2])

    # ---- position-wise feed forward -----------------------------------------
    fb = ffb_ref[...]                                # [2, FF] = [b1 ; b2(pad)]
    hdn = jnp.dot(y, w1_ref[...], preferred_element_type=jnp.float32) + fb[0:1, :]
    hdn = jnp.maximum(hdn, 0.0)
    ff = jnp.dot(hdn, w2_ref[...], preferred_element_type=jnp.float32) + fb[1:2, 0:E]

    y = y + ff                                       # dropout(p=0.0) == identity
    y = batch_norm(y, bnp[:, 2:3], bnp[:, 3:4])
    out_ref[...] = y


@jax.jit
def encoder_block(x, pe, pe_r, kp):
    """x, pe: [B, P, E]; pe_r: [B, H, P, P] -> [B, P, E]."""
    b_, p_, e_ = x.shape
    h_ = pe_r.shape[1]
    # per-call wrapper work: three free reshapes, nothing else.
    x2 = x.reshape(b_ * p_, e_)
    pe2 = pe.reshape(b_ * p_, e_)
    per_g = pe_r.reshape(b_ * h_, p_, p_)            # g = b*H + h

    vmem = pl.BlockSpec(memory_space=pltpu.MemorySpace.VMEM)
    out = pl.pallas_call(
        encoder_block_kernel,
        out_shape=jax.ShapeDtypeStruct((b_ * p_, e_), jnp.float32),
        in_specs=[vmem] * 8,
        out_specs=vmem,
    )(x2, pe2, per_g, kp["wstack"], kp["w1"], kp["w2"], kp["ffb"], kp["bnp"])
    return out.reshape(b_, p_, e_)


def init_params(key):
    ks = jax.random.split(key, 7)

    def xavier(k, fan_in, fan_out, shape):
        bound = math.sqrt(6.0 / (fan_in + fan_out))
        return jax.random.uniform(k, shape, jnp.float32, -bound, bound)

    return dict(
        # attention weights (pre-transposed to [in, out]); per-head column
        # grouping matches the PyTorch reshape: [q_h | k_h | v_h], [uq_h | uk_h].
        wqkv=xavier(ks[0], E, 3 * E, (E, 3 * E)),
        uquk=xavier(ks[1], E, 2 * E, (E, 2 * E)),
        wo=xavier(ks[2], E, E, (E, E)),
        # FFN
        w1=xavier(ks[3], E, FF, (E, FF)),
        b1=jax.random.uniform(ks[4], (FF,), jnp.float32, -0.1, 0.1),
        w2=xavier(ks[5], FF, E, (FF, E)),
        b2=jax.random.uniform(ks[6], (E,), jnp.float32, -0.1, 0.1),
        # BatchNorm affine params (default init gamma=1, beta=0)
        g1=jnp.ones((P,), jnp.float32), be1=jnp.zeros((P,), jnp.float32),
        g2=jnp.ones((P,), jnp.float32), be2=jnp.zeros((P,), jnp.float32),
    )


def prepare_kernel_params(p):
    """One-time weight repacking (OFF the per-call path, per review item 1)."""
    wqkv, uquk, wo = p["wqkv"], p["uquk"], p["wo"]
    qs, ks_, vs, uqs, uks, wos = [], [], [], [], [], []
    for h in range(H):
        b3 = h * 3 * HD
        qs.append(wqkv[:, b3:b3 + HD].T)                      # [HD, E]
        ks_.append(wqkv[:, b3 + HD:b3 + 2 * HD].T)
        vs.append(wqkv[:, b3 + 2 * HD:b3 + 3 * HD].T)
        b2_ = h * 2 * HD
        uqs.append(uquk[:, b2_:b2_ + HD].T)
        uks.append(uquk[:, b2_ + HD:b2_ + 2 * HD].T)
        wos.append(wo[h * HD:(h + 1) * HD, :])                # [HD, E]

    def gstack(lst):          # [H, HD, E] -> tile over batch -> [G, HD, E]
        return jnp.tile(jnp.stack(lst, axis=0), (B, 1, 1))    # g = b*H + h -> head h

    wstack = jnp.stack([gstack(qs), gstack(ks_), gstack(vs),
                        gstack(uqs), gstack(uks), gstack(wos)], axis=0)  # [6,G,HD,E]
    ffb = jnp.zeros((2, FF), jnp.float32)
    ffb = ffb.at[0, :].set(p["b1"]).at[1, :E].set(p["b2"])               # [2, FF]
    bnp = jnp.stack([p["g1"], p["be1"], p["g2"], p["be2"]], axis=1)      # [P, 4]
    return dict(wstack=wstack, w1=p["w1"], w2=p["w2"], ffb=ffb, bnp=bnp)


def reference(x, pe, pe_r, p):
    """Pure-JAX mirror of the PyTorch forward, for a correctness check."""
    qkv = x @ p["wqkv"]
    pet = pe @ p["uquk"]
    qkv = qkv.reshape(B, P, H, 3 * HD).transpose(0, 2, 1, 3)
    q, k, v = jnp.split(qkv, 3, axis=-1)
    pet = pet.reshape(B, P, H, 2 * HD).transpose(0, 2, 1, 3)
    uq, uk = jnp.split(pet, 2, axis=-1)
    logits = (jnp.einsum("bhqd,bhkd->bhqk", q, k)
              + jnp.einsum("bhqd,bhkd->bhqk", uq, uk)) * SCALE + pe_r
    attn = jax.nn.softmax(logits, axis=-1)
    vals = jnp.einsum("bhqk,bhkd->bhqd", attn, v)
    vals = vals.transpose(0, 2, 1, 3).reshape(B, P, E)
    y = x + vals @ p["wo"]

    def bn(z, g, bshift):
        m = z.mean(axis=(0, 2), keepdims=True)
        vv = ((z - m) ** 2).mean(axis=(0, 2), keepdims=True)
        return ((z - m) * jax.lax.rsqrt(vv + EPS) * g.reshape(1, P, 1)
                + bshift.reshape(1, P, 1))

    y = bn(y, p["g1"], p["be1"])
    ff = jax.nn.relu(y.reshape(B * P, E) @ p["w1"] + p["b1"]) @ p["w2"] + p["b2"]
    y = y + ff.reshape(B, P, E)
    return bn(y, p["g2"], p["be2"])


if __name__ == "__main__":
    key = jax.random.PRNGKey(0)
    kx, kpe, kper, kp = jax.random.split(key, 4)
    x = jax.random.normal(kx, (B, P, E), jnp.float32)
    pe = jax.random.normal(kpe, (B, P, E), jnp.float32)
    pe_r = 0.1 * jax.random.normal(kper, (B, H, P, P), jnp.float32)

    raw = init_params(kp)
    kparams = prepare_kernel_params(raw)     # one-time prep, off the call path

    out = encoder_block(x, pe, pe_r, kparams)
    out = jax.block_until_ready(out)
    assert out.shape == (B, P, E)

    with jax.default_matmul_precision("float32"):
        ref = reference(x, pe, pe_r, raw)
    max_err = float(jnp.max(jnp.abs(out - ref)))
    if not jnp.allclose(out, ref, rtol=2e-2, atol=2e-2):
        raise AssertionError(f"kernel/reference mismatch, max abs err = {max_err}")

    print("KERNEL_OK")
</pallas_src>

<mosaic_0001>
module attributes {stable_mosaic.version = 11 : i64} {
  func.func @encoder_block_kernel(%arg0: memref<16x32xf32, #tpu.memory_space<vmem>>, %arg1: memref<16x32xf32, #tpu.memory_space<vmem>>, %arg2: memref<8x8x8xf32, #tpu.memory_space<vmem>>, %arg3: memref<6x8x8x32xf32, #tpu.memory_space<vmem>>, %arg4: memref<32x64xf32, #tpu.memory_space<vmem>>, %arg5: memref<64x32xf32, #tpu.memory_space<vmem>>, %arg6: memref<2x64xf32, #tpu.memory_space<vmem>>, %arg7: memref<8x4xf32, #tpu.memory_space<vmem>>, %arg8: memref<16x32xf32, #tpu.memory_space<vmem>>) attributes {dimension_semantics = [], scalar_prefetch = 0 : i64, scratch_operands = 0 : i64, tpu.core_type = #tpu.core_type<tc>} {
    %c0 = arith.constant 0 : index
    %c0_0 = arith.constant 0 : index
    %0 = vector.load %arg0[%c0, %c0_0] : memref<16x32xf32, #tpu.memory_space<vmem>>, vector<16x32xf32>
    %c0_1 = arith.constant 0 : index
    %c0_2 = arith.constant 0 : index
    %1 = vector.load %arg1[%c0_1, %c0_2] : memref<16x32xf32, #tpu.memory_space<vmem>>, vector<16x32xf32>
    %2 = vector.shape_cast %0 : vector<16x32xf32> to vector<2x8x32xf32>
    %3 = vector.shape_cast %1 : vector<16x32xf32> to vector<2x8x32xf32>
    %4 = vector.shape_cast %2 : vector<2x8x32xf32> to vector<2x1x8x32xf32>
    %5 = vector.shape_cast %4 : vector<2x1x8x32xf32> to vector<2x1x8x32xf32>
    %6 = vector.broadcast %5 : vector<2x1x8x32xf32> to vector<2x4x8x32xf32>
    %7 = vector.shape_cast %6 : vector<2x4x8x32xf32> to vector<8x8x32xf32>
    %8 = vector.shape_cast %3 : vector<2x8x32xf32> to vector<2x1x8x32xf32>
    %9 = vector.shape_cast %8 : vector<2x1x8x32xf32> to vector<2x1x8x32xf32>
    %10 = vector.broadcast %9 : vector<2x1x8x32xf32> to vector<2x4x8x32xf32>
    %11 = vector.shape_cast %10 : vector<2x4x8x32xf32> to vector<8x8x32xf32>
    %c0_3 = arith.constant 0 : index
    %c0_4 = arith.constant 0 : index
    %c0_5 = arith.constant 0 : index
    %c0_6 = arith.constant 0 : index
    %12 = vector.load %arg3[%c0_3, %c0_4, %c0_5, %c0_6] : memref<6x8x8x32xf32, #tpu.memory_space<vmem>>, vector<1x8x8x32xf32>
    %13 = vector.shape_cast %12 : vector<1x8x8x32xf32> to vector<8x8x32xf32>
    "tpu.trace_start"() <{level = 10 : i32, message = "gpe,ghe->gph"}> : () -> ()
    %cst = arith.constant dense<0.000000e+00> : vector<8x8x8xf32>
    %14 = tpu.matmul %7, %13, %cst {dimension_numbers = #tpu.dot_dimension_numbers<[2], [2], [1], [1], [0, 0, 0, 1, 1, 1], [0], [0]>} : vector<8x8x32xf32>, vector<8x8x32xf32>, vector<8x8x8xf32> -> vector<8x8x8xf32>
    "tpu.trace_stop"() : () -> ()
    %c1 = arith.constant 1 : index
    %c0_7 = arith.constant 0 : index
    %c0_8 = arith.constant 0 : index
    %c0_9 = arith.constant 0 : index
    %15 = vector.load %arg3[%c1, %c0_7, %c0_8, %c0_9] : memref<6x8x8x32xf32, #tpu.memory_space<vmem>>, vector<1x8x8x32xf32>
    %16 = vector.shape_cast %15 : vector<1x8x8x32xf32> to vector<8x8x32xf32>
    "tpu.trace_start"() <{level = 10 : i32, message = "gpe,ghe->gph"}> : () -> ()
    %cst_10 = arith.constant dense<0.000000e+00> : vector<8x8x8xf32>
    %17 = tpu.matmul %7, %16, %cst_10 {dimension_numbers = #tpu.dot_dimension_numbers<[2], [2], [1], [1], [0, 0, 0, 1, 1, 1], [0], [0]>} : vector<8x8x32xf32>, vector<8x8x32xf32>, vector<8x8x8xf32> -> vector<8x8x8xf32>
    "tpu.trace_stop"() : () -> ()
    %c2 = arith.constant 2 : index
    %c0_11 = arith.constant 0 : index
    %c0_12 = arith.constant 0 : index
    %c0_13 = arith.constant 0 : index
    %18 = vector.load %arg3[%c2, %c0_11, %c0_12, %c0_13] : memref<6x8x8x32xf32, #tpu.memory_space<vmem>>, vector<1x8x8x32xf32>
    %19 = vector.shape_cast %18 : vector<1x8x8x32xf32> to vector<8x8x32xf32>
    "tpu.trace_start"() <{level = 10 : i32, message = "gpe,ghe->gph"}> : () -> ()
    %cst_14 = arith.constant dense<0.000000e+00> : vector<8x8x8xf32>
    %20 = tpu.matmul %7, %19, %cst_14 {dimension_numbers = #tpu.dot_dimension_numbers<[2], [2], [1], [1], [0, 0, 0, 1, 1, 1], [0], [0]>} : vector<8x8x32xf32>, vector<8x8x32xf32>, vector<8x8x8xf32> -> vector<8x8x8xf32>
    "tpu.trace_stop"() : () -> ()
    %c3 = arith.constant 3 : index
    %c0_15 = arith.constant 0 : index
    %c0_16 = arith.constant 0 : index
    %c0_17 = arith.constant 0 : index
    %21 = vector.load %arg3[%c3, %c0_15, %c0_16, %c0_17] : memref<6x8x8x32xf32, #tpu.memory_space<vmem>>, vector<1x8x8x32xf32>
    %22 = vector.shape_cast %21 : vector<1x8x8x32xf32> to vector<8x8x32xf32>
    "tpu.trace_start"() <{level = 10 : i32, message = "gpe,ghe->gph"}> : () -> ()
    %cst_18 = arith.constant dense<0.000000e+00> : vector<8x8x8xf32>
    %23 = tpu.matmul %11, %22, %cst_18 {dimension_numbers = #tpu.dot_dimension_numbers<[2], [2], [1], [1], [0, 0, 0, 1, 1, 1], [0], [0]>} : vector<8x8x32xf32>, vector<8x8x32xf32>, vector<8x8x8xf32> -> vector<8x8x8xf32>
    "tpu.trace_stop"() : () -> ()
    %c4 = arith.constant 4 : index
    %c0_19 = arith.constant 0 : index
    %c0_20 = arith.constant 0 : index
    %c0_21 = arith.constant 0 : index
    %24 = vector.load %arg3[%c4, %c0_19, %c0_20, %c0_21] : memref<6x8x8x32xf32, #tpu.memory_space<vmem>>, vector<1x8x8x32xf32>
    %25 = vector.shape_cast %24 : vector<1x8x8x32xf32> to vector<8x8x32xf32>
    "tpu.trace_start"() <{level = 10 : i32, message = "gpe,ghe->gph"}> : () -> ()
    %cst_22 = arith.constant dense<0.000000e+00> : vector<8x8x8xf32>
    %26 = tpu.matmul %11, %25, %cst_22 {dimension_numbers = #tpu.dot_dimension_numbers<[2], [2], [1], [1], [0, 0, 0, 1, 1, 1], [0], [0]>} : vector<8x8x32xf32>, vector<8x8x32xf32>, vector<8x8x8xf32> -> vector<8x8x8xf32>
    "tpu.trace_stop"() : () -> ()
    "tpu.trace_start"() <{level = 10 : i32, message = "gqc,gkc->gqk"}> : () -> ()
    %cst_23 = arith.constant dense<0.000000e+00> : vector<8x8x8xf32>
    %27 = tpu.matmul %14, %17, %cst_23 {dimension_numbers = #tpu.dot_dimension_numbers<[2], [2], [1], [1], [0, 0, 0, 1, 1, 1], [0], [0]>} : vector<8x8x8xf32>, vector<8x8x8xf32>, vector<8x8x8xf32> -> vector<8x8x8xf32>
    %cst_24 = arith.constant dense<0.000000e+00> : vector<8x8x8xf32>
    %28 = tpu.matmul %23, %26, %cst_24 {dimension_numbers = #tpu.dot_dimension_numbers<[2], [2], [1], [1], [0, 0, 0, 1, 1, 1], [0], [0]>} : vector<8x8x8xf32>, vector<8x8x8xf32>, vector<8x8x8xf32> -> vector<8x8x8xf32>
    "tpu.trace_stop"() : () -> ()
    %29 = arith.addf %27, %28 : vector<8x8x8xf32>
    %cst_25 = arith.constant 2.500000e-01 : f32
    %30 = vector.broadcast %cst_25 : f32 to vector<8x8x8xf32>
    %31 = arith.mulf %29, %30 : vector<8x8x8xf32>
    %c0_26 = arith.constant 0 : index
    %c0_27 = arith.constant 0 : index
    %c0_28 = arith.constant 0 : index
    %32 = vector.load %arg2[%c0_26, %c0_27, %c0_28] : memref<8x8x8xf32, #tpu.memory_space<vmem>>, vector<8x8x8xf32>
    %33 = arith.addf %31, %32 : vector<8x8x8xf32>
    %cst_29 = arith.constant dense<0xFF800000> : vector<8x8xf32>
    %34 = vector.multi_reduction <maximumf>, %33, %cst_29 [2] : vector<8x8x8xf32> to vector<8x8xf32>
    %35 = vector.shape_cast %34 : vector<8x8xf32> to vector<8x8x1xf32>
    %36 = vector.broadcast %35 : vector<8x8x1xf32> to vector<8x8x8xf32>
    %37 = arith.subf %33, %36 : vector<8x8x8xf32>
    %38 = math.exp %37 : vector<8x8x8xf32>
    %cst_30 = arith.constant dense<0.000000e+00> : vector<8x8xf32>
    %39 = vector.multi_reduction <add>, %38, %cst_30 [2] : vector<8x8x8xf32> to vector<8x8xf32>
    %40 = vector.shape_cast %39 : vector<8x8xf32> to vector<8x8x1xf32>
    %41 = tpu.reciprocal %40 {approx = true} : vector<8x8x1xf32> -> vector<8x8x1xf32>
    %42 = vector.broadcast %41 : vector<8x8x1xf32> to vector<8x8x8xf32>
    %43 = arith.mulf %38, %42 : vector<8x8x8xf32>
    "tpu.trace_start"() <{level = 10 : i32, message = "gqk,gkc->gqc"}> : () -> ()
    %cst_31 = arith.constant dense<0.000000e+00> : vector<8x8x8xf32>
    %44 = tpu.matmul %43, %20, %cst_31 {dimension_numbers = #tpu.dot_dimension_numbers<[2], [1], [1], [2], [0, 0, 0, 1, 1, 2], [0], [0]>} : vector<8x8x8xf32>, vector<8x8x8xf32>, vector<8x8x8xf32> -> vector<8x8x8xf32>
    "tpu.trace_stop"() : () -> ()
    %c5 = arith.constant 5 : index
    %c0_32 = arith.constant 0 : index
    %c0_33 = arith.constant 0 : index
    %c0_34 = arith.constant 0 : index
    %45 = vector.load %arg3[%c5, %c0_32, %c0_33, %c0_34] : memref<6x8x8x32xf32, #tpu.memory_space<vmem>>, vector<1x8x8x32xf32>
    %46 = vector.shape_cast %45 : vector<1x8x8x32xf32> to vector<8x8x32xf32>
    "tpu.trace_start"() <{level = 10 : i32, message = "gpc,gce->gpe"}> : () -> ()
    %cst_35 = arith.constant dense<0.000000e+00> : vector<8x8x32xf32>
    %47 = tpu.matmul %44, %46, %cst_35 {dimension_numbers = #tpu.dot_dimension_numbers<[2], [1], [1], [2], [0, 0, 0, 1, 1, 2], [0], [0]>} : vector<8x8x8xf32>, vector<8x8x32xf32>, vector<8x8x32xf32> -> vector<8x8x32xf32>
    "tpu.trace_stop"() : () -> ()
    %48 = vector.shape_cast %47 : vector<8x8x32xf32> to vector<2x4x8x32xf32>
    %cst_36 = arith.constant dense<0.000000e+00> : vector<2x8x32xf32>
    %49 = vector.multi_reduction <add>, %48, %cst_36 [1] : vector<2x4x8x32xf32> to vector<2x8x32xf32>
    %50 = vector.shape_cast %49 : vector<2x8x32xf32> to vector<16x32xf32>
    %51 = arith.addf %0, %50 : vector<16x32xf32>
    %c0_37 = arith.constant 0 : index
    %c0_38 = arith.constant 0 : index
    %52 = vector.load %arg7[%c0_37, %c0_38] : memref<8x4xf32, #tpu.memory_space<vmem>>, vector<8x4xf32>
    %53 = vector.extract_strided_slice %52 {offsets = [0, 0], sizes = [8, 1], strides = [1, 1]} : vector<8x4xf32> to vector<8x1xf32>
    %54 = vector.extract_strided_slice %52 {offsets = [0, 1], sizes = [8, 1], strides = [1, 1]} : vector<8x4xf32> to vector<8x1xf32>
    %55 = vector.shape_cast %51 : vector<16x32xf32> to vector<2x8x32xf32>
    %cst_39 = arith.constant dense<0.000000e+00> : vector<2x8xf32>
    %56 = vector.multi_reduction <add>, %55, %cst_39 [2] : vector<2x8x32xf32> to vector<2x8xf32>
    %57 = vector.shape_cast %56 : vector<2x8xf32> to vector<2x8x1xf32>
    %cst_40 = arith.constant 3.200000e+01 : f32
    %58 = vector.broadcast %cst_40 : f32 to vector<2x8x1xf32>
    %59 = arith.divf %57, %58 : vector<2x8x1xf32>
    %cst_41 = arith.constant dense<0.000000e+00> : vector<8x1xf32>
    %60 = vector.multi_reduction <add>, %59, %cst_41 [0] : vector<2x8x1xf32> to vector<8x1xf32>
    %61 = vector.shape_cast %60 : vector<8x1xf32> to vector<1x8x1xf32>
    %cst_42 = arith.constant 2.000000e+00 : f32
    %62 = vector.broadcast %cst_42 : f32 to vector<1x8x1xf32>
    %63 = arith.divf %61, %62 : vector<1x8x1xf32>
    %64 = vector.broadcast %63 : vector<1x8x1xf32> to vector<2x8x32xf32>
    %65 = arith.subf %55, %64 : vector<2x8x32xf32>
    %66 = arith.mulf %65, %65 : vector<2x8x32xf32>
    %cst_43 = arith.constant dense<0.000000e+00> : vector<2x8xf32>
    %67 = vector.multi_reduction <add>, %66, %cst_43 [2] : vector<2x8x32xf32> to vector<2x8xf32>
    %68 = vector.shape_cast %67 : vector<2x8xf32> to vector<2x8x1xf32>
    %cst_44 = arith.constant 3.200000e+01 : f32
    %69 = vector.broadcast %cst_44 : f32 to vector<2x8x1xf32>
    %70 = arith.divf %68, %69 : vector<2x8x1xf32>
    %cst_45 = arith.constant dense<0.000000e+00> : vector<8x1xf32>
    %71 = vector.multi_reduction <add>, %70, %cst_45 [0] : vector<2x8x1xf32> to vector<8x1xf32>
    %72 = vector.shape_cast %71 : vector<8x1xf32> to vector<1x8x1xf32>
    %cst_46 = arith.constant 2.000000e+00 : f32
    %73 = vector.broadcast %cst_46 : f32 to vector<1x8x1xf32>
    %74 = arith.divf %72, %73 : vector<1x8x1xf32>
    %cst_47 = arith.constant 9.99999974E-6 : f32
    %75 = vector.broadcast %cst_47 : f32 to vector<1x8x1xf32>
    %76 = arith.addf %74, %75 : vector<1x8x1xf32>
    %77 = math.rsqrt %76 : vector<1x8x1xf32>
    %78 = vector.shape_cast %53 : vector<8x1xf32> to vector<1x8x1xf32>
    %79 = arith.mulf %77, %78 : vector<1x8x1xf32>
    %80 = vector.broadcast %79 : vector<1x8x1xf32> to vector<2x8x32xf32>
    %81 = arith.mulf %65, %80 : vector<2x8x32xf32>
    %82 = vector.shape_cast %54 : vector<8x1xf32> to vector<1x8x1xf32>
    %83 = vector.broadcast %82 : vector<1x8x1xf32> to vector<2x8x32xf32>
    %84 = arith.addf %81, %83 : vector<2x8x32xf32>
    %85 = vector.shape_cast %84 : vector<2x8x32xf32> to vector<16x32xf32>
    %c0_48 = arith.constant 0 : index
    %c0_49 = arith.constant 0 : index
    %86 = vector.load %arg6[%c0_48, %c0_49] : memref<2x64xf32, #tpu.memory_space<vmem>>, vector<2x64xf32>
    %c0_50 = arith.constant 0 : index
    %c0_51 = arith.constant 0 : index
    %87 = vector.load %arg4[%c0_50, %c0_51] : memref<32x64xf32, #tpu.memory_space<vmem>>, vector<32x64xf32>
    %cst_52 = arith.constant dense<0.000000e+00> : vector<16x64xf32>
    %88 = tpu.matmul %85, %87, %cst_52 {dimension_numbers = #tpu.dot_dimension_numbers<[1], [0], [0], [1], [0, 0, 1, 1], [], []>} : vector<16x32xf32>, vector<32x64xf32>, vector<16x64xf32> -> vector<16x64xf32>
    %89 = vector.extract_strided_slice %86 {offsets = [0, 0], sizes = [1, 64], strides = [1, 1]} : vector<2x64xf32> to vector<1x64xf32>
    %90 = vector.broadcast %89 : vector<1x64xf32> to vector<16x64xf32>
    %91 = arith.addf %88, %90 : vector<16x64xf32>
    %cst_53 = arith.constant 0.000000e+00 : f32
    %92 = vector.broadcast %cst_53 : f32 to vector<16x64xf32>
    %93 = arith.maximumf %91, %92 : vector<16x64xf32>
    %c0_54 = arith.constant 0 : index
    %c0_55 = arith.constant 0 : index
    %94 = vector.load %arg5[%c0_54, %c0_55] : memref<64x32xf32, #tpu.memory_space<vmem>>, vector<64x32xf32>
    %cst_56 = arith.constant dense<0.000000e+00> : vector<16x32xf32>
    %95 = tpu.matmul %93, %94, %cst_56 {dimension_numbers = #tpu.dot_dimension_numbers<[1], [0], [0], [1], [0, 0, 1, 1], [], []>} : vector<16x64xf32>, vector<64x32xf32>, vector<16x32xf32> -> vector<16x32xf32>
    %96 = vector.extract_strided_slice %86 {offsets = [1, 0], sizes = [1, 32], strides = [1, 1]} : vector<2x64xf32> to vector<1x32xf32>
    %97 = vector.broadcast %96 : vector<1x32xf32> to vector<16x32xf32>
    %98 = arith.addf %95, %97 : vector<16x32xf32>
    %99 = arith.addf %85, %98 : vector<16x32xf32>
    %100 = vector.extract_strided_slice %52 {offsets = [0, 2], sizes = [8, 1], strides = [1, 1]} : vector<8x4xf32> to vector<8x1xf32>
    %101 = vector.extract_strided_slice %52 {offsets = [0, 3], sizes = [8, 1], strides = [1, 1]} : vector<8x4xf32> to vector<8x1xf32>
    %102 = vector.shape_cast %99 : vector<16x32xf32> to vector<2x8x32xf32>
    %cst_57 = arith.constant dense<0.000000e+00> : vector<2x8xf32>
    %103 = vector.multi_reduction <add>, %102, %cst_57 [2] : vector<2x8x32xf32> to vector<2x8xf32>
    %104 = vector.shape_cast %103 : vector<2x8xf32> to vector<2x8x1xf32>
    %cst_58 = arith.constant 3.200000e+01 : f32
    %105 = vector.broadcast %cst_58 : f32 to vector<2x8x1xf32>
    %106 = arith.divf %104, %105 : vector<2x8x1xf32>
    %cst_59 = arith.constant dense<0.000000e+00> : vector<8x1xf32>
    %107 = vector.multi_reduction <add>, %106, %cst_59 [0] : vector<2x8x1xf32> to vector<8x1xf32>
    %108 = vector.shape_cast %107 : vector<8x1xf32> to vector<1x8x1xf32>
    %cst_60 = arith.constant 2.000000e+00 : f32
    %109 = vector.broadcast %cst_60 : f32 to vector<1x8x1xf32>
    %110 = arith.divf %108, %109 : vector<1x8x1xf32>
    %111 = vector.broadcast %110 : vector<1x8x1xf32> to vector<2x8x32xf32>
    %112 = arith.subf %102, %111 : vector<2x8x32xf32>
    %113 = arith.mulf %112, %112 : vector<2x8x32xf32>
    %cst_61 = arith.constant dense<0.000000e+00> : vector<2x8xf32>
    %114 = vector.multi_reduction <add>, %113, %cst_61 [2] : vector<2x8x32xf32> to vector<2x8xf32>
    %115 = vector.shape_cast %114 : vector<2x8xf32> to vector<2x8x1xf32>
    %cst_62 = arith.constant 3.200000e+01 : f32
    %116 = vector.broadcast %cst_62 : f32 to vector<2x8x1xf32>
    %117 = arith.divf %115, %116 : vector<2x8x1xf32>
    %cst_63 = arith.constant dense<0.000000e+00> : vector<8x1xf32>
    %118 = vector.multi_reduction <add>, %117, %cst_63 [0] : vector<2x8x1xf32> to vector<8x1xf32>
    %119 = vector.shape_cast %118 : vector<8x1xf32> to vector<1x8x1xf32>
    %cst_64 = arith.constant 2.000000e+00 : f32
    %120 = vector.broadcast %cst_64 : f32 to vector<1x8x1xf32>
    %121 = arith.divf %119, %120 : vector<1x8x1xf32>
    %cst_65 = arith.constant 9.99999974E-6 : f32
    %122 = vector.broadcast %cst_65 : f32 to vector<1x8x1xf32>
    %123 = arith.addf %121, %122 : vector<1x8x1xf32>
    %124 = math.rsqrt %123 : vector<1x8x1xf32>
    %125 = vector.shape_cast %100 : vector<8x1xf32> to vector<1x8x1xf32>
    %126 = arith.mulf %124, %125 : vector<1x8x1xf32>
    %127 = vector.broadcast %126 : vector<1x8x1xf32> to vector<2x8x32xf32>
    %128 = arith.mulf %112, %127 : vector<2x8x32xf32>
    %129 = vector.shape_cast %101 : vector<8x1xf32> to vector<1x8x1xf32>
    %130 = vector.broadcast %129 : vector<1x8x1xf32> to vector<2x8x32xf32>
    %131 = arith.addf %128, %130 : vector<2x8x32xf32>
    %132 = vector.shape_cast %131 : vector<2x8x32xf32> to vector<16x32xf32>
    %c0_66 = arith.constant 0 : index
    %c0_67 = arith.constant 0 : index
    %133 = vector.load %arg8[%c0_66, %c0_67] : memref<16x32xf32, #tpu.memory_space<vmem>>, vector<16x32xf32>
    tpu.vector_store %arg8[%c0_66, %c0_67], %132 {strides = array<i32>} : memref<16x32xf32, #tpu.memory_space<vmem>>, vector<16x32xf32>,
    return
  }
}

</mosaic_0001>

<bundles_post_ra>
// kernel: encoder_block.1
= control target key start
LH: loop header
LB: loop body
LE: loop exit
PB: predicated region body
PF: predicated region fallthrough
CT: control target
= control target key end

     0   :  { %13 = vsyncpa [#allocation3], 0  ;;  %s7432_s0 = inlined_call_operand.hbm [shape: f32[16,32], index: 0, kind: input, shape index: {}]   ;;  %s7433_s1 = inlined_call_operand.hbm [shape: f32[16,32], index: 1, kind: input, shape index: {}]   ;;  %s7434_s2 = inlined_call_operand.vmem [shape: f32[8,8,8], index: 2, kind: input, shape index: {}]   ;;  %s7435_s3 = inlined_call_operand.hbm [shape: f32[6,8,8,32], index: 3, kind: input, shape index: {}]   ;;  %s7436_s4 = inlined_call_operand.vmem [shape: f32[32,64], index: 4, kind: input, shape index: {}]   ;;  %s7437_s5 = inlined_call_operand.vmem [shape: f32[64,32], index: 5, kind: input, shape index: {}]   ;;  %s7438_s6 = inlined_call_operand.vmem [shape: f32[2,64], index: 6, kind: input, shape index: {}]   ;;  %s7439_s7 = inlined_call_operand.vmem [shape: f32[8,4], index: 7, kind: input, shape index: {}]   ;;  %s7440_s8 = inlined_call_operand.hbm [shape: f32[16,32], index: 8, kind: output, shape index: {}]  }
   0x1   :  { %14 = vsyncpa [#allocation6], 0 }
   0x2   :  { %15 = vsyncpa [#allocation4], 0  ;;  %s6736_s27 = smov [#allocation5]   ;;  %s6737_s29 = smov [#allocation2]  }
   0x3   :  { %s33_s28 = sshll.u32 %s6736_s27, 4  ;;  %s21_s30 = sshll.u32 %s6737_s29, 4  ;;  %s34_s28 = int_to_ptr.vmem [resolvable:$true] %s33_s28  ;;  %s6793_s30 = int_to_ptr.vmem [resolvable:$true] %s21_s30 }
   0x4   :  { %s6642_s11 = scalar_lea.hbm %s7433_s1, 256 }
   0x5   :  { %p6643_p0 = scmp.ne.s32.totalorder %s7433_s1, %s6642_s11  ;;  %p6646_p1 = scmp.lt.u32.totalorder %s6642_s11, %s7433_s1 }
   0x7   :  { %p6648_p2 = pnand %p6646_p1, %p6643_p0 }
   0x9   :  { %6651 = shalt.err (!%p6648_p2)
}
   0xa   :  { %s6652_s16 = scalar_lea.vmem %s34_s28, 256  ;;  %p6657_p4 = scmp.lt.s32.totalorder %s34_s28, %s34_s28 }
   0xb   :  { %p6653_p3 = scmp.ne.s32.totalorder %s34_s28, %s6652_s16  ;;  %p6658_p5 = scmp.lt.s32.totalorder %s6652_s16, %s6652_s16 }
   0xd   :  { %p6659_p6 = por %p6658_p5, %p6657_p4 }
   0xf   :  { %p6660_p7 = pnand %p6659_p6, %p6653_p3 }
  0x11   :  { %6663 = shalt.err (!%p6660_p7)
}
  0x12   :  { %s6738_s17 = smov 128   ;;  %s6739_s18 = smov 8  }
  0x13   :  { %39 = dma.hbm_to_vmem [thread:$0]  %s7433_s1, 256, %s34_s28, [#allocation6], %s6738_s17, %s6738_s17, %s6739_s18  }
  0x14   :  { %s6664_s23 = scalar_lea.hbm %s7432_s0, 256 }
  0x15   :  { %p6665_p8 = scmp.ne.s32.totalorder %s7432_s0, %s6664_s23  ;;  %p6668_p9 = scmp.lt.u32.totalorder %s6664_s23, %s7432_s0 }
  0x17   :  { %p6670_p10 = pnand %p6668_p9, %p6665_p8 }
  0x19   :  { %6673 = shalt.err (!%p6670_p10)
}
  0x1a   :  { %s6674_s29 = scalar_lea.vmem %s6793_s30, 256  ;;  %p6679_p12 = scmp.lt.s32.totalorder %s6793_s30, %s6793_s30 }
  0x1b   :  { %p6675_p11 = scmp.ne.s32.totalorder %s6793_s30, %s6674_s29  ;;  %p6680_p13 = scmp.lt.s32.totalorder %s6674_s29, %s6674_s29 }
  0x1d   :  { %p6681_p0 = por %p6680_p13, %p6679_p12 }
  0x1f   :  { %p6682_p1 = pnand %p6681_p0, %p6675_p11 }
  0x21   :  { %6685 = shalt.err (!%p6682_p1)
}
  0x22   :  { %27 = dma.hbm_to_vmem [thread:$0]  %s7432_s0, 256, %s6793_s30, [#allocation3], %s6738_s17, %s6738_s17, %s6739_s18  }
  0x23   :  { %s6740_s9 = smov [#allocation7]   ;;  %s6686_s13 = scalar_lea.hbm %s7435_s3, 6144 }
  0x24   :  { %s47_s10 = sshll.u32 %s6740_s9, 4  ;;  %p6687_p2 = scmp.ne.s32.totalorder %s7435_s3, %s6686_s13  ;;  %s48_s10 = int_to_ptr.vmem [resolvable:$true] %s47_s10 }
  0x25   :  { %p6690_p3 = scmp.lt.u32.totalorder %s6686_s13, %s7435_s3 }
  0x27   :  { %p6692_p4 = pnand %p6690_p3, %p6687_p2 }
  0x29   :  { %6695 = shalt.err (!%p6692_p4)
}
  0x2a   :  { %s6696_s20 = scalar_lea.vmem %s48_s10, 6144  ;;  %p6701_p6 = scmp.lt.s32.totalorder %s48_s10, %s48_s10 }
  0x2b   :  { %p6697_p5 = scmp.ne.s32.totalorder %s48_s10, %s6696_s20  ;;  %p6702_p7 = scmp.lt.s32.totalorder %s6696_s20, %s6696_s20 }
  0x2d   :  { %p6703_p8 = por %p6702_p7, %p6701_p6 }
  0x2f   :  { %p6704_p9 = pnand %p6703_p8, %p6697_p5 }
  0x31   :  { %6707 = shalt.err (!%p6704_p9)
}
  0x32   :  { %53 = dma.hbm_to_vmem [thread:$0]  %s7435_s3, 6144, %s48_s10, [#allocation6], %s6738_s17, %s6738_s17, %s6739_s18  }
  0x33   :  { %6730 = dma.done.wait [#allocation3], 256  }
  0x34   :  { %6731 = vsyncadd [#allocation3], 4294967040 }
  0x35   :  { %6732 = dma.done.wait [#allocation6], 6400  }
  0x36   :  { %6733 = vsyncadd [#allocation6], 4294960896  ;;  %v6741_v0 = vmov 0.0   ;;  %vm6742_vm0 = vmmov 0   ;;  %vm83_vm1 = vcmask 261120   ;;  %v75_v1 = vld [vmem:[#allocation7] sm:$0xff] }
  0x37   :  { %6158 = vmatprep.subr.mxu0 %v6741_v0  ;;  %6173 = vmatprep.subr.mxu1 %v6741_v0  ;;  %v78_v2 = vld [vmem:[#allocation7 + $0x18] sm:$0xff]  ;;  %v6853_v3 = vld [vmem:[#allocation2] sm:$0xff]  ;;  %v76_v4 = vld [vmem:[#allocation7 + $0x8] sm:$0xff]  ;;  %vm3052_vm2 = vcmask 64512   ;;  %vm5722_vm3 = vcmask 523264  }
  0x38   :  { %6160 = vmatprep.mubr.msk.f32.mxu0 %vm6742_vm0, %v6741_v0  ;;  %6175 = vmatprep.mubr.msk.f32.mxu1 %vm6742_vm0, %v6741_v0  ;;  %v80_v5 = vld [vmem:[#allocation7 + $0x28] sm:$0xff]  ;;  %v77_v7 = vld [vmem:[#allocation7 + $0x10] sm:$0xff]  ;;  %v82_v8 = vld [vmem:[#allocation7 + $0x38] sm:$0xff] }
  0x39   :  { %6159 = vmatpush3.xpose.msk.msra.mxu0 %vm83_vm1, %v75_v1  ;;  %6174 = vmatpush3.xpose.msk.msra.mxu1 %vm83_vm1, %v78_v2  ;;  %v6863_v6 = vld [vmem:[#allocation2 + $0x8] sm:$0xff]  ;;  %v79_v9 = vld [vmem:[#allocation7 + $0x20] sm:$0xff]  ;;  %v81_v11 = vld [vmem:[#allocation7 + $0x30] sm:$0xff] }
  0x3a   :  { %6163 = vmatprep.subr.mxu0 %v6741_v0  ;;  %6183 = vmatprep.subr.mxu1 %v6741_v0  ;;  %v676_v10 = vld [vmem:[#allocation7 + $0x48] sm:$0xff]  ;;  %v678_v12 = vld [vmem:[#allocation7 + $0x58] sm:$0xff]  ;;  %v675_v13 = vld [vmem:[#allocation7 + $0x40] sm:$0xff] }
  0x3b   :  { %v680_v14 = vld [vmem:[#allocation7 + $0x68] sm:$0xff]  ;;  %v677_v15 = vld [vmem:[#allocation7 + $0x50] sm:$0xff]  ;;  %v682_v16 = vld [vmem:[#allocation7 + $0x78] sm:$0xff] }
  0x3c   :  { %6161 = vmatmul.mubr.msk.f32.vlgmr.msra.gmra.mrb[0].mxu0 %vm83_vm1, %v6853_v3  ;;  %6176 = vmatmul.mubr.msk.f32.vlgmr.msra.gmra.mrb[0].mxu1 %vm83_vm1, %v6853_v3  ;;  %v679_v17 = vld [vmem:[#allocation7 + $0x60] sm:$0xff]  ;;  %v1269_v18 = vld [vmem:[#allocation7 + $0x88] sm:$0xff]  ;;  %v681_v19 = vld [vmem:[#allocation7 + $0x70] sm:$0xff] }
  0x3d   :  { %6164 = vmatpush3.xpose.msk.msra.mxu0 %vm83_vm1, %v76_v4  ;;  %6184 = vmatpush3.xpose.msk.msra.mxu1 %vm83_vm1, %v80_v5  ;;  %v1271_v20 = vld [vmem:[#allocation7 + $0x98] sm:$0xff]  ;;  %v1268_v21 = vld [vmem:[#allocation7 + $0x80] sm:$0xff]  ;;  %v1273_v22 = vld [vmem:[#allocation7 + $0xa8] sm:$0xff] }
  0x3e   :  { %6165 = vmatprep.mubr.msk.f32.mxu0 %vm6742_vm0, %v6741_v0  ;;  %6185 = vmatprep.mubr.msk.f32.mxu1 %vm6742_vm0, %v6741_v0  ;;  %v1270_v23 = vld [vmem:[#allocation7 + $0x90] sm:$0xff]  ;;  %v1275_v24 = vld [vmem:[#allocation7 + $0xb8] sm:$0xff]  ;;  %v1272_v25 = vld [vmem:[#allocation7 + $0xa0] sm:$0xff] }
  0x3f   :  { %6168 = vmatprep.subr.mxu0 %v6741_v0  ;;  %6193 = vmatprep.subr.mxu1 %v6741_v0  ;;  %v1862_v26 = vld [vmem:[#allocation7 + $0xc8] sm:$0xff]  ;;  %v6985_v27 = vld [vmem:[#allocation5] sm:$0xff]  ;;  %v1864_v29 = vld [vmem:[#allocation7 + $0xd8] sm:$0xff] }
  0x40   :  { %6166 = vmatmul.mubr.msk.f32.vlgmr.msra.gmra.mrb[2].mxu0 %vm83_vm1, %v6853_v3  ;;  %6186 = vmatmul.mubr.msk.f32.vlgmr.msra.gmra.mrb[2].mxu1 %vm83_vm1, %v6863_v6  ;;  %v1274_v28 = vld [vmem:[#allocation7 + $0xb0] sm:$0xff]  ;;  %v1861_v30 = vld [vmem:[#allocation7 + $0xc0] sm:$0xff]  ;;  %v1866_v31 = vld [vmem:[#allocation7 + $0xe8] sm:$0xff] }
  0x41   :  { %6169 = vmatpush3.xpose.msk.msra.mxu0 %vm83_vm1, %v77_v7  ;;  %6194 = vmatpush3.xpose.msk.msra.mxu1 %vm83_vm1, %v82_v8  ;;  %v7011_v32 = vld [vmem:[#allocation5 + $0x8] sm:$0xff]  ;;  %v1863_v33 = vld [vmem:[#allocation7 + $0xd0] sm:$0xff]  ;;  %v1865_v35 = vld [vmem:[#allocation7 + $0xe0] sm:$0xff] }
  0x42   :  { %6170 = vmatprep.mubr.msk.f32.mxu0 %vm6742_vm0, %v6741_v0  ;;  %6195 = vmatprep.mubr.msk.f32.mxu1 %vm6742_vm0, %v6741_v0  ;;  %v1868_v34 = vld [vmem:[#allocation7 + $0xf8] sm:$0xff]  ;;  %v2461_v36 = vld [vmem:[#allocation7 + $0x108] sm:$0xff]  ;;  %v1867_v37 = vld [vmem:[#allocation7 + $0xf0] sm:$0xff] }
  0x43   :  { %6178 = vmatprep.subr.mxu0 %v6741_v0  ;;  %6203 = vmatprep.subr.mxu1 %v6741_v0  ;;  %v2463_v38 = vld [vmem:[#allocation7 + $0x118] sm:$0xff]  ;;  %v2460_v39 = vld [vmem:[#allocation7 + $0x100] sm:$0xff]  ;;  %v2465_v40 = vld [vmem:[#allocation7 + $0x128] sm:$0xff] }
  0x44   :  { %6171 = vmatmul.mubr.msk.f32.vlgmr.msra.gmra.mrb[4].mxu0 %vm83_vm1, %v6853_v3  ;;  %6196 = vmatmul.mubr.msk.f32.vlgmr.msra.gmra.mrb[4].mxu1 %vm83_vm1, %v6863_v6  ;;  %v2462_v41 = vld [vmem:[#allocation7 + $0x110] sm:$0xff]  ;;  %v2467_v42 = vld [vmem:[#allocation7 + $0x138] sm:$0xff]  ;;  %v2464_v43 = vld [vmem:[#allocation7 + $0x120] sm:$0xff] }
  0x45   :  { %6179 = vmatpush3.xpose.msk.msra.mxu0 %vm83_vm1, %v79_v9  ;;  %6204 = vmatpush3.xpose.msk.msra.mxu1 %vm83_vm1, %v676_v10  ;;  %v2466_v44 = vld [vmem:[#allocation7 + $0x130] sm:$0xff] }
  0x46   :  { %6180 = vmatprep.mubr.msk.f32.mxu0 %vm6742_vm0, %v6741_v0  ;;  %6205 = vmatprep.mubr.msk.f32.mxu1 %vm6742_vm0, %v6741_v0 }
  0x47   :  { %6188 = vmatprep.subr.mxu0 %v6741_v0  ;;  %6213 = vmatprep.subr.mxu1 %v6741_v0 }
  0x48   :  { %6181 = vmatmul.mubr.msk.f32.vlgmr.msra.gmra.mrb[6].mxu0 %vm83_vm1, %v6863_v6  ;;  %6206 = vmatmul.mubr.msk.f32.vlgmr.msra.gmra.mrb[6].mxu1 %vm83_vm1, %v6853_v3 }
  0x49   :  { %6189 = vmatpush3.xpose.msk.msra.mxu0 %vm83_vm1, %v81_v11  ;;  %6214 = vmatpush3.xpose.msk.msra.mxu1 %vm83_vm1, %v678_v12 }
  0x4a   :  { %6190 = vmatprep.mubr.msk.f32.mxu0 %vm6742_vm0, %v6741_v0  ;;  %6215 = vmatprep.mubr.msk.f32.mxu1 %vm6742_vm0, %v6741_v0 }
  0x4b   :  { %6198 = vmatprep.subr.mxu0 %v6741_v0  ;;  %6223 = vmatprep.subr.mxu1 %v6741_v0 }
  0x4c   :  { %6191 = vmatmul.mubr.msk.f32.vlgmr.msra.gmra.mrb[8].mxu0 %vm83_vm1, %v6863_v6  ;;  %6216 = vmatmul.mubr.msk.f32.vlgmr.msra.gmra.mrb[8].mxu1 %vm83_vm1, %v6853_v3 }
  0x4d   :  { %6199 = vmatpush3.xpose.msk.msra.mxu0 %vm83_vm1, %v675_v13  ;;  %6224 = vmatpush3.xpose.msk.msra.mxu1 %vm83_vm1, %v680_v14 }
  0x4e   :  { %6200 = vmatprep.mubr.msk.f32.mxu0 %vm6742_vm0, %v6741_v0  ;;  %6225 = vmatprep.mubr.msk.f32.mxu1 %vm6742_vm0, %v6741_v0 }
  0x4f   :  { %6208 = vmatprep.subr.mxu0 %v6741_v0  ;;  %6233 = vmatprep.subr.mxu1 %v6741_v0 }
  0x50   :  { %6201 = vmatmul.mubr.msk.f32.vlgmr.msra.gmra.mrb[10].mxu0 %vm83_vm1, %v6853_v3  ;;  %6226 = vmatmul.mubr.msk.f32.vlgmr.msra.gmra.mrb[10].mxu1 %vm83_vm1, %v6863_v6 }
  0x51   :  { %6209 = vmatpush3.xpose.msk.msra.mxu0 %vm83_vm1, %v677_v15  ;;  %6234 = vmatpush3.xpose.msk.msra.mxu1 %vm83_vm1, %v682_v16 }
  0x52   :  { %6210 = vmatprep.mubr.msk.f32.mxu0 %vm6742_vm0, %v6741_v0  ;;  %6235 = vmatprep.mubr.msk.f32.mxu1 %vm6742_vm0, %v6741_v0 }
  0x53   :  { %6218 = vmatprep.subr.mxu0 %v6741_v0  ;;  %6243 = vmatprep.subr.mxu1 %v6741_v0 }
  0x54   :  { %6211 = vmatmul.mubr.msk.f32.vlgmr.msra.gmra.mrb[12].mxu0 %vm83_vm1, %v6853_v3  ;;  %6236 = vmatmul.mubr.msk.f32.vlgmr.msra.gmra.mrb[12].mxu1 %vm83_vm1, %v6863_v6 }
  0x55   :  { %6219 = vmatpush3.xpose.msk.msra.mxu0 %vm83_vm1, %v679_v17  ;;  %6244 = vmatpush3.xpose.msk.msra.mxu1 %vm83_vm1, %v1269_v18 }
  0x56   :  { %6220 = vmatprep.mubr.msk.f32.mxu0 %vm6742_vm0, %v6741_v0  ;;  %6245 = vmatprep.mubr.msk.f32.mxu1 %vm6742_vm0, %v6741_v0 }
  0x57   :  { %6228 = vmatprep.subr.mxu0 %v6741_v0  ;;  %6253 = vmatprep.subr.mxu1 %v6741_v0 }
  0x58   :  { %6221 = vmatmul.mubr.msk.f32.vlgmr.msra.gmra.mrb[14].mxu0 %vm83_vm1, %v6863_v6  ;;  %6246 = vmatmul.mubr.msk.f32.vlgmr.msra.gmra.mrb[14].mxu1 %vm83_vm1, %v6853_v3 }
  0x59   :  { %6229 = vmatpush3.xpose.msk.msra.mxu0 %vm83_vm1, %v681_v19  ;;  %6254 = vmatpush3.xpose.msk.msra.mxu1 %vm83_vm1, %v1271_v20 }
  0x5a   :  { %6230 = vmatprep.mubr.msk.f32.mxu0 %vm6742_vm0, %v6741_v0  ;;  %6255 = vmatprep.mubr.msk.f32.mxu1 %vm6742_vm0, %v6741_v0 }
  0x5b   :  { %6238 = vmatprep.subr.mxu0 %v6741_v0  ;;  %6263 = vmatprep.subr.mxu1 %v6741_v0 }
  0x5c   :  { %6231 = vmatmul.mubr.msk.f32.vlgmr.msra.gmra.mrb[16].mxu0 %vm83_vm1, %v6863_v6  ;;  %6256 = vmatmul.mubr.msk.f32.vlgmr.msra.gmra.mrb[16].mxu1 %vm83_vm1, %v6853_v3 }
  0x5d   :  { %6239 = vmatpush3.xpose.msk.msra.mxu0 %vm83_vm1, %v1268_v21  ;;  %6264 = vmatpush3.xpose.msk.msra.mxu1 %vm83_vm1, %v1273_v22 }
  0x5e   :  { %6240 = vmatprep.mubr.msk.f32.mxu0 %vm6742_vm0, %v6741_v0  ;;  %6265 = vmatprep.mubr.msk.f32.mxu1 %vm6742_vm0, %v6741_v0 }
  0x5f   :  { %6248 = vmatprep.subr.mxu0 %v6741_v0  ;;  %6273 = vmatprep.subr.mxu1 %v6741_v0 }
  0x60   :  { %6241 = vmatmul.mubr.msk.f32.vlgmr.msra.gmra.mrb[18].mxu0 %vm83_vm1, %v6853_v3  ;;  %6266 = vmatmul.mubr.msk.f32.vlgmr.msra.gmra.mrb[18].mxu1 %vm83_vm1, %v6863_v6 }
  0x61   :  { %6249 = vmatpush3.xpose.msk.msra.mxu0 %vm83_vm1, %v1270_v23  ;;  %6274 = vmatpush3.xpose.msk.msra.mxu1 %vm83_vm1, %v1275_v24 }
  0x62   :  { %6250 = vmatprep.mubr.msk.f32.mxu0 %vm6742_vm0, %v6741_v0  ;;  %6275 = vmatprep.mubr.msk.f32.mxu1 %vm6742_vm0, %v6741_v0 }
  0x63   :  { %6258 = vmatprep.subr.mxu0 %v6741_v0  ;;  %6283 = vmatprep.subr.mxu1 %v6741_v0 }
  0x64   :  { %6251 = vmatmul.mubr.msk.f32.vlgmr.msra.gmra.mrb[20].mxu0 %vm83_vm1, %v6853_v3  ;;  %6276 = vmatmul.mubr.msk.f32.vlgmr.msra.gmra.mrb[20].mxu1 %vm83_vm1, %v6863_v6 }
  0x65   :  { %6259 = vmatpush3.xpose.msk.msra.mxu0 %vm83_vm1, %v1272_v25  ;;  %6284 = vmatpush3.xpose.msk.msra.mxu1 %vm83_vm1, %v1862_v26 }
  0x66   :  { %6260 = vmatprep.mubr.msk.f32.mxu0 %vm6742_vm0, %v6741_v0  ;;  %6285 = vmatprep.mubr.msk.f32.mxu1 %vm6742_vm0, %v6741_v0 }
  0x67   :  { %6268 = vmatprep.subr.mxu0 %v6741_v0  ;;  %6293 = vmatprep.subr.mxu1 %v6741_v0 }
  0x68   :  { %6261 = vmatmul.mubr.msk.f32.vlgmr.msra.gmra.mrb[22].mxu0 %vm83_vm1, %v6863_v6  ;;  %6286 = vmatmul.mubr.msk.f32.vlgmr.msra.gmra.mrb[22].mxu1 %vm83_vm1, %v6985_v27 }
  0x69   :  { %6269 = vmatpush3.xpose.msk.msra.mxu0 %vm83_vm1, %v1274_v28  ;;  %6294 = vmatpush3.xpose.msk.msra.mxu1 %vm83_vm1, %v1864_v29 }
  0x6a   :  { %6270 = vmatprep.mubr.msk.f32.mxu0 %vm6742_vm0, %v6741_v0  ;;  %6295 = vmatprep.mubr.msk.f32.mxu1 %vm6742_vm0, %v6741_v0 }
  0x6b   :  { %6278 = vmatprep.subr.mxu0 %v6741_v0  ;;  %6303 = vmatprep.subr.mxu1 %v6741_v0 }
  0x6c   :  { %6271 = vmatmul.mubr.msk.f32.vlgmr.msra.gmra.mrb[24].mxu0 %vm83_vm1, %v6863_v6  ;;  %6296 = vmatmul.mubr.msk.f32.vlgmr.msra.gmra.mrb[24].mxu1 %vm83_vm1, %v6985_v27 }
  0x6d   :  { %6279 = vmatpush3.xpose.msk.msra.mxu0 %vm83_vm1, %v1861_v30  ;;  %6304 = vmatpush3.xpose.msk.msra.mxu1 %vm83_vm1, %v1866_v31 }
  0x6e   :  { %6280 = vmatprep.mubr.msk.f32.mxu0 %vm6742_vm0, %v6741_v0  ;;  %6305 = vmatprep.mubr.msk.f32.mxu1 %vm6742_vm0, %v6741_v0 }
  0x6f   :  { %6288 = vmatprep.subr.mxu0 %v6741_v0  ;;  %6313 = vmatprep.subr.mxu1 %v6741_v0 }
  0x70   :  { %6281 = vmatmul.mubr.msk.f32.vlgmr.msra.gmra.mrb[26].mxu0 %vm83_vm1, %v6985_v27  ;;  %6306 = vmatmul.mubr.msk.f32.vlgmr.msra.gmra.mrb[26].mxu1 %vm83_vm1, %v7011_v32 }
  0x71   :  { %6289 = vmatpush3.xpose.msk.msra.mxu0 %vm83_vm1, %v1863_v33  ;;  %6314 = vmatpush3.xpose.msk.msra.mxu1 %vm83_vm1, %v1868_v34 }
  0x72   :  { %6290 = vmatprep.mubr.msk.f32.mxu0 %vm6742_vm0, %v6741_v0  ;;  %6315 = vmatprep.mubr.msk.f32.mxu1 %vm6742_vm0, %v6741_v0 }
  0x73   :  { %6298 = vmatprep.subr.mxu0 %v6741_v0  ;;  %6323 = vmatprep.subr.mxu1 %v6741_v0 }
  0x74   :  { %6291 = vmatmul.mubr.msk.f32.vlgmr.msra.gmra.mrb[28].mxu0 %vm83_vm1, %v6985_v27  ;;  %6316 = vmatmul.mubr.msk.f32.vlgmr.msra.gmra.mrb[28].mxu1 %vm83_vm1, %v7011_v32 }
  0x75   :  { %6299 = vmatpush3.xpose.msk.msra.mxu0 %vm83_vm1, %v1865_v35  ;;  %6324 = vmatpush3.xpose.msk.msra.mxu1 %vm83_vm1, %v2461_v36 }
  0x76   :  { %6300 = vmatprep.mubr.msk.f32.mxu0 %vm6742_vm0, %v6741_v0  ;;  %6325 = vmatprep.mubr.msk.f32.mxu1 %vm6742_vm0, %v6741_v0 }
  0x77   :  { %6308 = vmatprep.subr.mxu0 %v6741_v0  ;;  %6333 = vmatprep.subr.mxu1 %v6741_v0 }
  0x78   :  { %6301 = vmatmul.mubr.msk.f32.vlgmr.msra.gmra.mrb[30].mxu0 %vm83_vm1, %v7011_v32  ;;  %6326 = vmatmul.mubr.msk.f32.vlgmr.msra.gmra.mrb[30].mxu1 %vm83_vm1, %v6985_v27 }
  0x79   :  { %6309 = vmatpush3.xpose.msk.msra.mxu0 %vm83_vm1, %v1867_v37  ;;  %6334 = vmatpush3.xpose.msk.msra.mxu1 %vm83_vm1, %v2463_v38 }
  0x7a   :  { %6310 = vmatprep.mubr.msk.f32.mxu0 %vm6742_vm0, %v6741_v0  ;;  %6335 = vmatprep.mubr.msk.f32.mxu1 %vm6742_vm0, %v6741_v0 }
  0x7b   :  { %6318 = vmatprep.subr.mxu0 %v6741_v0  ;;  %6343 = vmatprep.subr.mxu1 %v6741_v0 }
  0x7c   :  { %6311 = vmatmul.mubr.msk.f32.vlgmr.msra.gmra.mrb[32].mxu0 %vm83_vm1, %v7011_v32  ;;  %6336 = vmatmul.mubr.msk.f32.vlgmr.msra.gmra.mrb[32].mxu1 %vm83_vm1, %v6985_v27 }
  0x7d   :  { %6319 = vmatpush3.xpose.msk.msra.mxu0 %vm83_vm1, %v2460_v39  ;;  %6344 = vmatpush3.xpose.msk.msra.mxu1 %vm83_vm1, %v2465_v40 }
  0x7e   :  { %6320 = vmatprep.mubr.msk.f32.mxu0 %vm6742_vm0, %v6741_v0  ;;  %6345 = vmatprep.mubr.msk.f32.mxu1 %vm6742_vm0, %v6741_v0 }
  0x7f   :  { %6328 = vmatprep.subr.mxu0 %v6741_v0  ;;  %6353 = vmatprep.subr.mxu1 %v6741_v0 }
  0x80   :  { %6321 = vmatmul.mubr.msk.f32.vlgmr.msra.gmra.mrb[34].mxu0 %vm83_vm1, %v6985_v27  ;;  %6346 = vmatmul.mubr.msk.f32.vlgmr.msra.gmra.mrb[34].mxu1 %vm83_vm1, %v7011_v32 }
  0x81   :  { %6329 = vmatpush3.xpose.msk.msra.mxu0 %vm83_vm1, %v2462_v41  ;;  %6354 = vmatpush3.xpose.msk.msra.mxu1 %vm83_vm1, %v2467_v42 }
  0x82   :  { %6330 = vmatprep.mubr.msk.f32.mxu0 %vm6742_vm0, %v6741_v0  ;;  %6355 = vmatprep.mubr.msk.f32.mxu1 %vm6742_vm0, %v6741_v0 }
  0x83   :  { %6338 = vmatprep.subr.mxu0 %v6741_v0  ;;  %6363 = vmatprep.subr.mxu1 %v6741_v0 }
  0x84   :  { %6331 = vmatmul.mubr.msk.f32.vlgmr.msra.gmra.mrb[36].mxu0 %vm83_vm1, %v6985_v27  ;;  %6356 = vmatmul.mubr.msk.f32.vlgmr.msra.gmra.mrb[36].mxu1 %vm83_vm1, %v7011_v32 }
  0x85   :  { %6339 = vmatpush3.xpose.msk.msra.mxu0 %vm83_vm1, %v2464_v43  ;;  %6340 = vmatprep.mubr.msk.f32.mxu0 %vm6742_vm0, %v6741_v0 }
  0x86   :  { %6348 = vmatprep.subr.mxu0 %v6741_v0  ;;  %6365 = vmatprep.mubr.msk.f32.mxu1 %vm6742_vm0, %v6741_v0 }
  0x88   :  { %6341 = vmatmul.mubr.msk.f32.vlgmr.msra.gmra.mrb[38].mxu0 %vm83_vm1, %v7011_v32 }
  0x89   :  { %6349 = vmatpush3.xpose.msk.msra.mxu0 %vm83_vm1, %v2466_v44  ;;  %6350 = vmatprep.mubr.msk.f32.mxu0 %vm6742_vm0, %v6741_v0 }
  0x8a   :  { %6358 = vmatprep.subr.mxu0 %v6741_v0 }
  0x8c   :  { %6351 = vmatmul.mubr.msk.f32.vlgmr.msra.gmra.mrb[40].mxu0 %vm83_vm1, %v7011_v32 }
  0x8d   :  { %6360 = vmatprep.mubr.msk.f32.mxu0 %vm6742_vm0, %v6741_v0 }
 0x10f   :  { %v7099_v45 = vpop.f32.mrb[0].mxu0  ;;  %v7101_v46 = vpop.f32.mrb[0].mxu1 }
 0x110   :  { %v6162_v47 = vpop.f32.mrb[1].mxu0  ;;  %v6177_v48 = vpop.f32.mrb[1].mxu1 }
 0x113   :  { %v7103_v49 = vpop.f32.mrb[2].mxu0  ;;  %v7105_v50 = vpop.f32.mrb[2].mxu1 }
 0x114   :  { %v6167_v51 = vpop.f32.mrb[3].mxu0  ;;  %v6187_v52 = vpop.f32.mrb[3].mxu1 }
 0x117   :  { %v7107_v53 = vpop.f32.mrb[4].mxu0  ;;  %v7109_v54 = vpop.f32.mrb[4].mxu1 }
 0x118   :  { %v6172_v55 = vpop.f32.mrb[5].mxu0  ;;  %v6197_v56 = vpop.f32.mrb[5].mxu1 }
 0x11b   :  { %v7111_v57 = vpop.f32.mrb[6].mxu0  ;;  %v7113_v58 = vpop.f32.mrb[6].mxu1 }
 0x11c   :  { %v6182_v59 = vpop.f32.mrb[7].mxu0  ;;  %v6207_v60 = vpop.f32.mrb[7].mxu1 }
 0x11f   :  { %v7115_v61 = vpop.f32.mrb[8].mxu0  ;;  %v7117_v62 = vpop.f32.mrb[8].mxu1 }
 0x120   :  { %v6192_v63 = vpop.f32.mrb[9].mxu0  ;;  %v6217_v1 = vpop.f32.mrb[9].mxu1 }
 0x123   :  { %v7119_v2 = vpop.f32.mrb[10].mxu0  ;;  %v7121_v3 = vpop.f32.mrb[10].mxu1 }
 0x124   :  { %v6202_v4 = vpop.f32.mrb[11].mxu0  ;;  %v6227_v5 = vpop.f32.mrb[11].mxu1 }
 0x127   :  { %v7123_v6 = vpop.f32.mrb[12].mxu0  ;;  %v7125_v7 = vpop.f32.mrb[12].mxu1 }
 0x128   :  { %v6212_v8 = vpop.f32.mrb[13].mxu0  ;;  %v6237_v9 = vpop.f32.mrb[13].mxu1 }
 0x12b   :  { %v7127_v10 = vpop.f32.mrb[14].mxu0  ;;  %v7129_v11 = vpop.f32.mrb[14].mxu1 }
 0x12c   :  { %v6222_v12 = vpop.f32.mrb[15].mxu0  ;;  %v6247_v13 = vpop.f32.mrb[15].mxu1 }
 0x12f   :  { %v7131_v14 = vpop.f32.mrb[16].mxu0  ;;  %v7133_v15 = vpop.f32.mrb[16].mxu1 }
 0x130   :  { %v6232_v16 = vpop.f32.mrb[17].mxu0  ;;  %v6257_v17 = vpop.f32.mrb[17].mxu1 }
 0x133   :  { %v7135_v18 = vpop.f32.mrb[18].mxu0  ;;  %v7137_v19 = vpop.f32.mrb[18].mxu1 }
 0x134   :  { %v6242_v20 = vpop.f32.mrb[19].mxu0  ;;  %v6267_v21 = vpop.f32.mrb[19].mxu1 }
 0x137   :  { %v7139_v22 = vpop.f32.mrb[20].mxu0  ;;  %v7141_v23 = vpop.f32.mrb[20].mxu1 }
 0x138   :  { %v6252_v24 = vpop.f32.mrb[21].mxu0  ;;  %v6277_v25 = vpop.f32.mrb[21].mxu1 }
 0x139   :  { %v4280_v25 = vld [vmem:[%s7434_s2 + $0x18] sm:$0xff] }
 0x13b   :  { %v7143_v26 = vpop.f32.mrb[22].mxu0  ;;  %v2014_v27 = vpop.f32.mrb[22].mxu1 }
 0x13c   :  { %v6262_v28 = vpop.f32.mrb[23].mxu0  ;;  %v6287_v29 = vpop.f32.mrb[23].mxu1 }
 0x13f   :  { %v7145_v30 = vpop.f32.mrb[24].mxu0  ;;  %v2160_v31 = vpop.f32.mrb[24].mxu1 }
 0x140   :  { %v6272_v32 = vpop.f32.mrb[25].mxu0  ;;  %v6297_v33 = vpop.f32.mrb[25].mxu1 }
 0x143   :  { %v1941_v34 = vpop.f32.mrb[26].mxu0  ;;  %v2309_v35 = vpop.f32.mrb[26].mxu1 }
 0x144   :  { %v6282_v36 = vpop.f32.mrb[27].mxu0  ;;  %v6307_v37 = vpop.f32.mrb[27].mxu1 }
 0x145   :  { %v4282_v37 = vld [vmem:[%s7434_s2 + $0x28] sm:$0xff] }
 0x147   :  { %v2087_v38 = vpop.f32.mrb[28].mxu0  ;;  %v2455_v39 = vpop.f32.mrb[28].mxu1 }
 0x148   :  { %v6292_v40 = vpop.f32.mrb[29].mxu0  ;;  %v6317_v41 = vpop.f32.mrb[29].mxu1 }
 0x149   :  { %v4283_v41 = vld [vmem:[%s7434_s2 + $0x30] sm:$0xff] }
 0x14b   :  { %v2236_v42 = vpop.f32.mrb[30].mxu0  ;;  %v2610_v43 = vpop.f32.mrb[30].mxu1 }
 0x14c   :  { %v6302_v44 = vpop.f32.mrb[31].mxu0  ;;  %6364 = vmatpush3.xpose.msk.msra.mxu1 %vm3052_vm2, %v2610_v43  ;;  %v6327_v47 = vpop.f32.mrb[31].mxu1 }
 0x14d   :  { %6373 = vmatprep.subr.mxu1 %v6741_v0 }
 0x14f   :  { %v2382_v48 = vpop.f32.mrb[32].mxu0  ;;  %v2756_v51 = vpop.f32.mrb[32].mxu1  ;;  %6366 = vmatmul.mubr.msk.f32.vlgmr.msra.gmra.mrb[38].mxu1 %vm3052_vm2, %v2014_v27 }
 0x150   :  { %v6312_v52 = vpop.f32.mrb[33].mxu0  ;;  %6374 = vmatpush3.xpose.msk.msra.mxu1 %vm3052_vm2, %v2756_v51  ;;  %v6337_v55 = vpop.f32.mrb[33].mxu1  ;;  %6375 = vmatprep.mubr.msk.f32.mxu1 %vm6742_vm0, %v6741_v0  ;;  %v4284_v51 = vld [vmem:[%s7434_s2 + $0x38] sm:$0xff] }
 0x151   :  { %6383 = vmatprep.subr.mxu1 %v6741_v0 }
 0x153   :  { %v2537_v56 = vpop.f32.mrb[34].mxu0  ;;  %v2902_v59 = vpop.f32.mrb[34].mxu1  ;;  %6376 = vmatmul.mubr.msk.f32.vlgmr.msra.gmra.mrb[40].mxu1 %vm3052_vm2, %v2160_v31  ;;  %v4281_v31 = vld [vmem:[%s7434_s2 + $0x20] sm:$0xff] }
 0x154   :  { %v6322_v60 = vpop.f32.mrb[35].mxu0  ;;  %6359 = vmatpush3.xpose.msk.msra.mxu0 %vm3052_vm2, %v2537_v56  ;;  %6384 = vmatpush3.xpose.msk.msra.mxu1 %vm3052_vm2, %v2902_v59  ;;  %v6347_v63 = vpop.f32.mrb[35].mxu1 }
 0x155   :  { %6385 = vmatprep.mubr.msk.f32.mxu1 %vm6742_vm0, %v6741_v0  ;;  %6368 = vmatprep.subr.mxu0 %v6741_v0 }
 0x156   :  { %6393 = vmatprep.subr.mxu1 %v6741_v0 }
 0x157   :  { %v2683_v1 = vpop.f32.mrb[36].mxu0  ;;  %v3048_v4 = vpop.f32.mrb[36].mxu1  ;;  %6361 = vmatmul.mubr.msk.f32.vlgmr.msra.gmra.mrb[42].mxu0 %vm3052_vm2, %v1941_v34  ;;  %6386 = vmatmul.mubr.msk.f32.vlgmr.msra.gmra.mrb[42].mxu1 %vm3052_vm2, %v2309_v35 }
 0x158   :  { %v6332_v5 = vpop.f32.mrb[37].mxu0  ;;  %6369 = vmatpush3.xpose.msk.msra.mxu0 %vm3052_vm2, %v2683_v1  ;;  %6394 = vmatpush3.xpose.msk.msra.mxu1 %vm3052_vm2, %v3048_v4  ;;  %v6357_v8 = vpop.f32.mrb[37].mxu1 }
 0x159   :  { %6370 = vmatprep.mubr.msk.f32.mxu0 %vm6742_vm0, %v6741_v0  ;;  %6395 = vmatprep.mubr.msk.f32.mxu1 %vm6742_vm0, %v6741_v0 }
 0x15a   :  { %6378 = vmatprep.subr.mxu0 %v6741_v0  ;;  %6403 = vmatprep.subr.mxu1 %v6741_v0 }
 0x15b   :  { %v2829_v9 = vpop.f32.mrb[38].mxu0  ;;  %6371 = vmatmul.mubr.msk.f32.vlgmr.msra.gmra.mrb[44].mxu0 %vm3052_vm2, %v2087_v38  ;;  %6396 = vmatmul.mubr.msk.f32.vlgmr.msra.gmra.mrb[44].mxu1 %vm3052_vm2, %v2455_v39 }
 0x15c   :  { %v6342_v12 = vpop.f32.mrb[39].mxu0  ;;  %6379 = vmatpush3.xpose.msk.msra.mxu0 %vm3052_vm2, %v2829_v9  ;;  %6404 = vmatpush3.xpose.msk.msra.mxu1 %vm3052_vm2, %v7113_v58 }
 0x15d   :  { %6380 = vmatprep.mubr.msk.f32.mxu0 %vm6742_vm0, %v6741_v0  ;;  %6405 = vmatprep.mubr.msk.f32.mxu1 %vm6742_vm0, %v6741_v0 }
 0x15e   :  { %6388 = vmatprep.subr.mxu0 %v6741_v0  ;;  %6413 = vmatprep.subr.mxu1 %v6741_v0 }
 0x15f   :  { %v2975_v13 = vpop.f32.mrb[40].mxu0  ;;  %6381 = vmatmul.mubr.msk.f32.vlgmr.msra.gmra.mrb[46].mxu0 %vm3052_vm2, %v2236_v42  ;;  %6406 = vmatmul.mubr.msk.f32.vlgmr.msra.gmra.mrb[38].mxu1 %vm3052_vm2, %v7103_v49 }
 0x160   :  { %v6352_v16 = vpop.f32.mrb[41].mxu0  ;;  %6389 = vmatpush3.xpose.msk.msra.mxu0 %vm3052_vm2, %v2975_v13  ;;  %6414 = vmatpush3.xpose.msk.msra.mxu1 %vm3052_vm2, %v7117_v62 }
 0x161   :  { %6390 = vmatprep.mubr.msk.f32.mxu0 %vm6742_vm0, %v6741_v0  ;;  %6415 = vmatprep.mubr.msk.f32.mxu1 %vm6742_vm0, %v6741_v0 }
 0x162   :  { %6398 = vmatprep.subr.mxu0 %v6741_v0  ;;  %6423 = vmatprep.subr.mxu1 %v6741_v0 }
 0x163   :  { %6391 = vmatmul.mubr.msk.f32.vlgmr.msra.gmra.mrb[48].mxu0 %vm3052_vm2, %v2382_v48  ;;  %6416 = vmatmul.mubr.msk.f32.vlgmr.msra.gmra.mrb[40].mxu1 %vm3052_vm2, %v7101_v46 }
 0x164   :  { %6399 = vmatpush3.xpose.msk.msra.mxu0 %vm3052_vm2, %v7119_v2  ;;  %6424 = vmatpush3.xpose.msk.msra.mxu1 %vm3052_vm2, %v7121_v3  ;;  %v4278_v3 = vld [vmem:[%s7434_s2 + $0x8] sm:$0xff] }
 0x165   :  { %6400 = vmatprep.mubr.msk.f32.mxu0 %vm6742_vm0, %v6741_v0  ;;  %6425 = vmatprep.mubr.msk.f32.mxu1 %vm6742_vm0, %v6741_v0 }
 0x166   :  { %6408 = vmatprep.subr.mxu0 %v6741_v0  ;;  %6433 = vmatprep.subr.mxu1 %v6741_v0 }
 0x167   :  { %6401 = vmatmul.mubr.msk.f32.vlgmr.msra.gmra.mrb[42].mxu0 %vm3052_vm2, %v7099_v45  ;;  %6426 = vmatmul.mubr.msk.f32.vlgmr.msra.gmra.mrb[42].mxu1 %vm3052_vm2, %v7105_v50 }
 0x168   :  { %6409 = vmatpush3.xpose.msk.msra.mxu0 %vm3052_vm2, %v7123_v6  ;;  %6434 = vmatpush3.xpose.msk.msra.mxu1 %vm3052_vm2, %v7125_v7 }
 0x169   :  { %6410 = vmatprep.mubr.msk.f32.mxu0 %vm6742_vm0, %v6741_v0  ;;  %6435 = vmatprep.mubr.msk.f32.mxu1 %vm6742_vm0, %v6741_v0 }
 0x16a   :  { %6418 = vmatprep.subr.mxu0 %v6741_v0  ;;  %6443 = vmatprep.subr.mxu1 %v6741_v0 }
 0x16b   :  { %6411 = vmatmul.mubr.msk.f32.vlgmr.msra.gmra.mrb[44].mxu0 %vm3052_vm2, %v7107_v53  ;;  %6436 = vmatmul.mubr.msk.f32.vlgmr.msra.gmra.mrb[44].mxu1 %vm3052_vm2, %v7109_v54 }
 0x16c   :  { %6419 = vmatpush3.xpose.msk.msra.mxu0 %vm3052_vm2, %v7127_v10  ;;  %6444 = vmatpush3.msra.mxu1 %v7129_v11 }
 0x16d   :  { %6420 = vmatprep.mubr.msk.f32.mxu0 %vm6742_vm0, %v6741_v0  ;;  %6428 = vmatprep.subr.mxu0 %v6741_v0 }
 0x16e   :  { %6445 = vmatprep.mubr.msk.f32.mxu1 %vm6742_vm0, %v6741_v0  ;;  %6453 = vmatprep.subr.mxu1 %v6741_v0 }
 0x16f   :  { %6421 = vmatmul.mubr.msk.f32.vlgmr.msra.gmra.mrb[46].mxu0 %vm3052_vm2, %v7111_v57  ;;  %v4277_v57 = vld [vmem:[%s7434_s2] sm:$0xff] }
 0x170   :  { %6429 = vmatpush3.xpose.msk.msra.mxu0 %vm3052_vm2, %v7131_v14  ;;  %6430 = vmatprep.mubr.msk.f32.mxu0 %vm6742_vm0, %v6741_v0  ;;  %v4279_v14 = vld [vmem:[%s7434_s2 + $0x10] sm:$0xff] }
 0x171   :  { %6438 = vmatprep.subr.mxu0 %v6741_v0 }
 0x173   :  { %6431 = vmatmul.mubr.msk.f32.vlgmr.msra.gmra.mrb[48].mxu0 %vm3052_vm2, %v7115_v61 }
 0x174   :  { %6439 = vmatpush3.msra.mxu0 %v7135_v18  ;;  %6440 = vmatprep.mubr.msk.f32.mxu0 %vm6742_vm0, %v6741_v0 }
 0x175   :  { %6448 = vmatprep.subr.mxu0 %v6741_v0 }
 0x232   :  { %v3809_v45 = vpop.f32.mrb[38].mxu1 }
 0x233   :  { %v6407_v46 = vpop.f32.mrb[39].mxu1  ;;  %v4270_v58 = vmul.f32 0.25, %v3809_v45 }
 0x235   :  { %v4286_v24 = vadd.f32 %v4278_v3, %v4270_v58 }
 0x236   :  { %v3961_v49 = vpop.f32.mrb[40].mxu1 }
 0x237   :  { %v6417_v50 = vpop.f32.mrb[41].mxu1  ;;  %v4272_v7 = vmul.f32 0.25, %v3961_v49  ;;  %v4296_v35 = vsel %vm3052_vm2, %v4286_v24, -inf }
 0x239   :  { %v4288_v29 = vadd.f32 %v4280_v25, %v4272_v7 }
 0x23a   :  { %v3733_v53 = vpop.f32.mrb[42].mxu0  ;;  %v4113_v54 = vpop.f32.mrb[42].mxu1 }
 0x23b   :  { %v4269_v62 = vmul.f32 0.25, %v3733_v53  ;;  %v6402_v61 = vpop.f32.mrb[43].mxu0  ;;  %v6427_v2 = vpop.f32.mrb[43].mxu1  ;;  %v4274_v32 = vmul.f32 0.25, %v4113_v54  ;;  %v4302_v40 = vsel %vm3052_vm2, %v4288_v29, -inf }
 0x23d   :  { %v4285_v6 = vadd.f32 %v4277_v57, %v4269_v62  ;;  %v4290_v48 = vadd.f32 %v4282_v37, %v4274_v32 }
 0x23e   :  { %v3885_v10 = vpop.f32.mrb[44].mxu0  ;;  %v4265_v11 = vpop.f32.mrb[44].mxu1 }
 0x23f   :  { %v4271_v17 = vmul.f32 0.25, %v3885_v10  ;;  %v6412_v18 = vpop.f32.mrb[45].mxu0  ;;  %v6437_v20 = vpop.f32.mrb[45].mxu1  ;;  %v4293_v21 = vsel %vm3052_vm2, %v4285_v6, -inf  ;;  %v4276_v42 = vmul.f32 0.25, %v4265_v11  ;;  %v4308_v55 = vsel %vm3052_vm2, %v4290_v48, -inf }
 0x240   :  { %4294 = vmax.xlane.f32.xlu0 %v4293_v21 }
 0x241   :  { %v4287_v27 = vadd.f32 %v4279_v14, %v4271_v17  ;;  %v4292_v59 = vadd.f32 %v4284_v51, %v4276_v42 }
 0x242   :  { %v4037_v28 = vpop.f32.mrb[46].mxu0 }
 0x243   :  { %v4273_v33 = vmul.f32 0.25, %v4037_v28  ;;  %v6422_v34 = vpop.f32.mrb[47].mxu0  ;;  %v4299_v36 = vsel %vm3052_vm2, %v4287_v27, -inf  ;;  %v4314_v60 = vsel %vm3052_vm2, %v4292_v59, -inf }
 0x244   :  { %4297 = vmax.xlane.f32.xlu0 %v4296_v35  ;;  %4300 = vmax.xlane.f32.xlu1 %v4299_v36 }
 0x245   :  { %v4289_v38 = vadd.f32 %v4281_v31, %v4273_v33 }
 0x246   :  { %v4189_v39 = vpop.f32.mrb[48].mxu0 }
 0x247   :  { %v4275_v43 = vmul.f32 0.25, %v4189_v39  ;;  %v6432_v44 = vpop.f32.mrb[49].mxu0  ;;  %v4305_v47 = vsel %vm3052_vm2, %v4289_v38, -inf }
 0x248   :  { %4303 = vmax.xlane.f32.xlu1 %v4302_v40  ;;  %4306 = vmax.xlane.f32.xlu0 %v4305_v47 }
 0x249   :  { %v4291_v52 = vadd.f32 %v4283_v41, %v4275_v43 }
 0x24b   :  { %v4311_v56 = vsel %vm3052_vm2, %v4291_v52, -inf }
 0x24c   :  { %4309 = vmax.xlane.f32.xlu1 %v4308_v55  ;;  %4312 = vmax.xlane.f32.xlu0 %v4311_v56 }
 0x250   :  { %4315 = vmax.xlane.f32.xlu1 %v4314_v60 }
 0x2cd   :  { %v4295_v63 = vpop.xlane.xlu0 %4294 }
 0x2ce   :  { %v4317_v1 = vsub.f32 %v4285_v6, %v4295_v63 }
 0x2d0   :  { %v4325_v4 = vmul.f32 1.442695, %v4317_v1 }
 0x2d1   :  { %v4298_v5 = vpop.xlane.xlu0 %4297  ;;  %v4301_v8 = vpop.xlane.xlu1 %4300 }
 0x2d2   :  { %6604 = vpow2.f32 %v4325_v4  ;;  %v4318_v9 = vsub.f32 %v4286_v24, %v4298_v5  ;;  %v4319_v12 = vsub.f32 %v4287_v27, %v4301_v8  ;;  %v4967_v5 = vld [vmem:[#allocation7 + $0x148] sm:$0xff] }
 0x2d4   :  { %v4327_v13 = vmul.f32 1.442695, %v4318_v9  ;;  %v4329_v16 = vmul.f32 1.442695, %v4319_v12  ;;  %v4969_v12 = vld [vmem:[#allocation7 + $0x158] sm:$0xff] }
 0x2d5   :  { %v4304_v45 = vpop.xlane.xlu1 %4303  ;;  %v4307_v46 = vpop.xlane.xlu0 %4306 }
 0x2d6   :  { %6606 = vpow2.f32 %v4327_v13  ;;  %v4320_v49 = vsub.f32 %v4288_v29, %v4304_v45  ;;  %v4321_v50 = vsub.f32 %v4289_v38, %v4307_v46 }
 0x2d7   :  { %6608 = vpow2.f32 %v4329_v16  ;;  %v4970_v16 = vld [vmem:[#allocation7 + $0x160] sm:$0xff] }
 0x2d8   :  { %v4331_v53 = vmul.f32 1.442695, %v4320_v49  ;;  %v4333_v54 = vmul.f32 1.442695, %v4321_v50  ;;  %v4971_v50 = vld [vmem:[#allocation7 + $0x168] sm:$0xff] }
 0x2d9   :  { %v4310_v57 = vpop.xlane.xlu1 %4309  ;;  %v4313_v58 = vpop.xlane.xlu0 %4312 }
 0x2da   :  { %6610 = vpow2.f32 %v4331_v53  ;;  %v4322_v62 = vsub.f32 %v4290_v48, %v4310_v57  ;;  %v4323_v61 = vsub.f32 %v4291_v52, %v4313_v58 }
 0x2db   :  { %6612 = vpow2.f32 %v4333_v54  ;;  %v4972_v54 = vld [vmem:[#allocation7 + $0x170] sm:$0xff] }
 0x2dc   :  { %v6605_v2 = vpop.eup %6604  ;;  %v4335_v3 = vmul.f32 1.442695, %v4322_v62  ;;  %v4337_v6 = vmul.f32 1.442695, %v4323_v61  ;;  %v4973_v61 = vld [vmem:[#allocation7 + $0x178] sm:$0xff] }
 0x2dd   :  { %v4316_v7 = vpop.xlane.xlu1 %4315  ;;  %v4341_v10 = vsel %vm3052_vm2, %v6605_v2, 0.0 }
 0x2de   :  { %6614 = vpow2.f32 %v4335_v3  ;;  %v4324_v11 = vsub.f32 %v4292_v59, %v4316_v7  ;;  %4342 = vadd.xlane.f32.xlu0 %v4341_v10 }
 0x2df   :  { %6616 = vpow2.f32 %v4337_v6 }
 0x2e0   :  { %v6607_v14 = vpop.eup %6606  ;;  %v4339_v17 = vmul.f32 1.442695, %v4324_v11 }
 0x2e1   :  { %v6609_v18 = vpop.eup %6608  ;;  %v4344_v20 = vsel %vm3052_vm2, %v6607_v14, 0.0 }
 0x2e2   :  { %6618 = vpow2.f32 %v4339_v17  ;;  %4345 = vadd.xlane.f32.xlu1 %v4344_v20  ;;  %v4347_v21 = vsel %vm3052_vm2, %v6609_v18, 0.0 }
 0x2e3   :  { %4348 = vadd.xlane.f32.xlu0 %v4347_v21 }
 0x2e4   :  { %v6611_v24 = vpop.eup %6610 }
 0x2e5   :  { %v6613_v25 = vpop.eup %6612  ;;  %v4350_v27 = vsel %vm3052_vm2, %v6611_v24, 0.0 }
 0x2e6   :  { %4351 = vadd.xlane.f32.xlu1 %v4350_v27  ;;  %v4353_v28 = vsel %vm3052_vm2, %v6613_v25, 0.0 }
 0x2e7   :  { %4354 = vadd.xlane.f32.xlu0 %v4353_v28 }
 0x2e8   :  { %v6615_v29 = vpop.eup %6614 }
 0x2e9   :  { %v6617_v31 = vpop.eup %6616  ;;  %v4356_v32 = vsel %vm3052_vm2, %v6615_v29, 0.0 }
 0x2ea   :  { %4357 = vadd.xlane.f32.xlu1 %v4356_v32  ;;  %v4359_v33 = vsel %vm3052_vm2, %v6617_v31, 0.0 }
 0x2eb   :  { %4360 = vadd.xlane.f32.xlu0 %v4359_v33 }
 0x2ec   :  { %v6619_v34 = vpop.eup %6618 }
 0x2ed   :  { %v4362_v35 = vsel %vm3052_vm2, %v6619_v34, 0.0 }
 0x2ee   :  { %4363 = vadd.xlane.f32.xlu1 %v4362_v35 }
 0x36b   :  { %v4343_v36 = vpop.xlane.xlu0 %4342 }
 0x36c   :  { %6620 = vrcp.f32 %v4343_v36 }
 0x36f   :  { %v4346_v37 = vpop.xlane.xlu1 %4345 }
 0x370   :  { %6622 = vrcp.f32 %v4346_v37  ;;  %v4349_v38 = vpop.xlane.xlu0 %4348 }
 0x371   :  { %6624 = vrcp.f32 %v4349_v38  ;;  %v6640_v38 = vld [vmem:[#allocation2] sm:$0xff] }
 0x373   :  { %v4352_v39 = vpop.xlane.xlu1 %4351 }
 0x374   :  { %6626 = vrcp.f32 %v4352_v39  ;;  %v4355_v40 = vpop.xlane.xlu0 %4354 }
 0x375   :  { %6628 = vrcp.f32 %v4355_v40 }
 0x376   :  { %v6621_v41 = vpop.eup %6620 }
 0x377   :  { %v4373_v42 = vmul.f32 %v6621_v41, %v6605_v2  ;;  %v4358_v43 = vpop.xlane.xlu1 %4357 }
 0x378   :  { %6630 = vrcp.f32 %v4358_v43  ;;  %v4361_v44 = vpop.xlane.xlu0 %4360 }
 0x379   :  { %6632 = vrcp.f32 %v4361_v44  ;;  %6441 = vmatmul.mubr.msk.f32.vlgmr.msra.gmra.mrb[50].mxu0 %vm3052_vm2, %v4373_v42 }
 0x37a   :  { %v6623_v47 = vpop.eup %6622  ;;  %6449 = vmatpush3.msra.mxu0 %v7139_v22  ;;  %6450 = vmatprep.mubr.msk.f32.mxu0 %vm6742_vm0, %v6741_v0 }
 0x37b   :  { %v6625_v48 = vpop.eup %6624  ;;  %v4374_v51 = vmul.f32 %v6623_v47, %v6607_v14  ;;  %v4364_v52 = vpop.xlane.xlu1 %4363  ;;  %6458 = vmatprep.subr.mxu0 %v6741_v0 }
 0x37c   :  { %v4375_v55 = vmul.f32 %v6625_v48, %v6609_v18  ;;  %6634 = vrcp.f32 %v4364_v52 }
 0x37d   :  { %6446 = vmatmul.mubr.msk.f32.vlgmr.msra.gmra.mrb[46].mxu1 %vm3052_vm2, %v4374_v51 }
 0x37e   :  { %v6627_v56 = vpop.eup %6626  ;;  %6451 = vmatmul.mubr.msk.f32.vlgmr.msra.gmra.mrb[52].mxu0 %vm3052_vm2, %v4375_v55  ;;  %6454 = vmatpush3.msra.mxu1 %v7133_v15 }
 0x37f   :  { %v6629_v59 = vpop.eup %6628  ;;  %v4376_v60 = vmul.f32 %v6627_v56, %v6611_v24  ;;  %6459 = vmatpush3.msra.mxu0 %v7143_v26  ;;  %6455 = vmatprep.mubr.msk.f32.mxu1 %vm6742_vm0, %v6741_v0 }
 0x380   :  { %v4377_v22 = vmul.f32 %v6629_v59, %v6613_v25  ;;  %6460 = vmatprep.mubr.msk.f32.mxu0 %vm6742_vm0, %v6741_v0  ;;  %6463 = vmatprep.subr.mxu1 %v6741_v0 }
 0x381   :  { %6468 = vmatprep.subr.mxu0 %v6741_v0  ;;  %6456 = vmatmul.mubr.msk.f32.vlgmr.msra.gmra.mrb[48].mxu1 %vm3052_vm2, %v4376_v60 }
 0x382   :  { %v6631_v63 = vpop.eup %6630  ;;  %6461 = vmatmul.mubr.msk.f32.vlgmr.msra.gmra.mrb[54].mxu0 %vm3052_vm2, %v4377_v22  ;;  %6464 = vmatpush3.msra.mxu1 %v7137_v19  ;;  %v6641_v22 = vld [vmem:[#allocation2 + $0x8] sm:$0xff] }
 0x383   :  { %v6633_v15 = vpop.eup %6632  ;;  %v4378_v26 = vmul.f32 %v6631_v63, %v6615_v29  ;;  %6469 = vmatpush3.msra.mxu0 %v7145_v30  ;;  %6465 = vmatprep.mubr.msk.f32.mxu1 %vm6742_vm0, %v6741_v0  ;;  %v4966_v30 = vld [vmem:[#allocation7 + $0x140] sm:$0xff] }
 0x384   :  { %v4379_v1 = vmul.f32 %v6633_v15, %v6617_v31  ;;  %6470 = vmatprep.mubr.msk.f32.mxu0 %vm6742_vm0, %v6741_v0  ;;  %6473 = vmatprep.subr.mxu1 %v6741_v0 }
 0x385   :  { %6466 = vmatmul.mubr.msk.f32.vlgmr.msra.gmra.mrb[50].mxu1 %vm3052_vm2, %v4378_v26  ;;  %6478 = vmatprep.subr.mxu0 %v6741_v0 }
 0x386   :  { %v6635_v4 = vpop.eup %6634  ;;  %6471 = vmatmul.mubr.msk.f32.vlgmr.msra.gmra.mrb[56].mxu0 %vm3052_vm2, %v4379_v1  ;;  %6474 = vmatpush3.msra.mxu1 %v7141_v23  ;;  %v4968_v23 = vld [vmem:[#allocation7 + $0x150] sm:$0xff] }
 0x387   :  { %v4380_v19 = vmul.f32 %v6635_v4, %v6619_v34  ;;  %6475 = vmatprep.mubr.msk.f32.mxu1 %vm6742_vm0, %v6741_v0  ;;  %6480 = vmatprep.mubr.msk.f32.mxu0 %vm6742_vm0, %v6741_v0 }
 0x388   :  { %6483 = vmatprep.subr.mxu1 %v6741_v0  ;;  %6479 = vmatpush3.msra.mxu0 %v4966_v30 }
 0x389   :  { %6476 = vmatmul.mubr.msk.f32.vlgmr.msra.gmra.mrb[52].mxu1 %vm3052_vm2, %v4380_v19  ;;  %6488 = vmatprep.subr.mxu0 %v6741_v0 }
 0x38a   :  { %6485 = vmatprep.mubr.msk.f32.mxu1 %vm6742_vm0, %v6741_v0  ;;  %6484 = vmatpush3.msra.mxu1 %v4967_v5 }
 0x38b   :  { %6493 = vmatprep.subr.mxu1 %v6741_v0 }
 0x44c   :  { %v4450_v8 = vpop.f32.mrb[50].mxu0 }
 0x44d   :  { %v6442_v9 = vpop.f32.mrb[51].mxu0  ;;  %6481 = vmatmul.mubr.msk.f32.vlgmr.msra.gmra.mrb[58].mxu0 %vm3052_vm2, %v4450_v8 }
 0x44e   :  { %6489 = vmatpush3.msra.mxu0 %v4968_v23  ;;  %6490 = vmatprep.mubr.msk.f32.mxu0 %vm6742_vm0, %v6741_v0 }
 0x44f   :  { %6498 = vmatprep.subr.mxu0 %v6741_v0 }
 0x450   :  { %v4523_v13 = vpop.f32.mrb[46].mxu1 }
 0x451   :  { %v4596_v45 = vpop.f32.mrb[52].mxu0  ;;  %v6447_v46 = vpop.f32.mrb[47].mxu1  ;;  %6486 = vmatmul.mubr.msk.f32.vlgmr.msra.gmra.mrb[54].mxu1 %vm3052_vm2, %v4523_v13 }
 0x452   :  { %v6452_v49 = vpop.f32.mrb[53].mxu0  ;;  %6491 = vmatmul.mubr.msk.f32.vlgmr.msra.gmra.mrb[60].mxu0 %vm3052_vm2, %v4596_v45  ;;  %6494 = vmatpush3.msra.mxu1 %v4969_v12  ;;  %v6743_v45 = vmov 0   ;;  %v5619_v46 = vld [vmem:[%s7436_s4] sm:$0xff] }
 0x453   :  { %6495 = vmatprep.mubr.msk.f32.mxu1 %vm6742_vm0, %v6741_v0  ;;  %6499 = vmatpush3.msra.mxu0 %v4970_v16  ;;  %v5620_v49 = vld [vmem:[%s7436_s4 + $0x8] sm:$0xff] }
 0x454   :  { %v4669_v53 = vpop.f32.mrb[48].mxu1  ;;  %6500 = vmatprep.mubr.msk.f32.mxu0 %vm6742_vm0, %v6741_v0  ;;  %6503 = vmatprep.subr.mxu1 %v6741_v0 }
 0x455   :  { %v4742_v57 = vpop.f32.mrb[54].mxu0  ;;  %v6457_v58 = vpop.f32.mrb[49].mxu1  ;;  %6496 = vmatmul.mubr.msk.f32.vlgmr.msra.gmra.mrb[56].mxu1 %vm3052_vm2, %v4669_v53  ;;  %6508 = vmatprep.subr.mxu0 %v6741_v0  ;;  %v6744_v53 = vmov 1  }
 0x456   :  { %v6462_v62 = vpop.f32.mrb[55].mxu0  ;;  %6501 = vmatmul.mubr.msk.f32.vlgmr.msra.gmra.mrb[62].mxu0 %vm3052_vm2, %v4742_v57  ;;  %6504 = vmatpush3.msra.mxu1 %v4971_v50  ;;  %v7370_v50 = vld [vmem:[%s7439_s7] sm:$0xff] }
 0x457   :  { %6505 = vmatprep.mubr.msk.f32.mxu1 %vm6742_vm0, %v6741_v0  ;;  %6509 = vmatpush3.msra.mxu0 %v4972_v54  ;;  %v6548_v54 = vpack.c.bf16 %v5620_v49, %v5619_v46 }
 0x458   :  { %v4815_v2 = vpop.f32.mrb[50].mxu1  ;;  %6510 = vmatprep.mubr.msk.f32.mxu0 %vm6742_vm0, %v6741_v0  ;;  %6513 = vmatprep.subr.mxu1 %v6741_v0 }
 0x459   :  { %v4888_v3 = vpop.f32.mrb[56].mxu0  ;;  %v6467_v6 = vpop.f32.mrb[51].mxu1  ;;  %6506 = vmatmul.mubr.msk.f32.vlgmr.msra.gmra.mrb[58].mxu1 %vm3052_vm2, %v4815_v2  ;;  %6600 = vset.pattern.permute.xlu0 %v6743_v45 }
 0x45a   :  { %v6472_v7 = vpop.f32.mrb[57].mxu0  ;;  %6511 = vmatmul.mubr.msk.f32.vlgmr.msra.gmra.mrb[64].mxu0 %vm3052_vm2, %v4888_v3  ;;  %6514 = vmatpush3.msra.mxu1 %v4973_v61 }
 0x45b   :  { %6515 = vmatprep.mubr.msk.f32.mxu1 %vm6742_vm0, %v6741_v0  ;;  %6601 = vset.pattern.permute.xlu1 %v6744_v53 }
 0x45c   :  { %v4961_v10 = vpop.f32.mrb[52].mxu1  ;;  %6549 = vmatprep.subr.bf16.mxu0 %v6548_v54 }
 0x45d   :  { %v6477_v11 = vpop.f32.mrb[53].mxu1  ;;  %6516 = vmatmul.mubr.msk.f32.vlgmr.msra.gmra.mrb[60].mxu1 %vm3052_vm2, %v4961_v10  ;;  %6551 = vmatpush3.bf16.msra.mxu0 %v6548_v54 }
 0x45e   :  { %v5621_v11 = vld [vmem:[%s7436_s4 + $0x10] sm:$0xff] }
 0x520   :  { %v5043_v14 = vpop.f32.mrb[58].mxu0 }
 0x521   :  { %v6482_v17 = vpop.f32.mrb[59].mxu0  ;;  %v5558_v20 = vsel %vm83_vm1, %v5043_v14, 0.0  ;;  %v5622_v14 = vld [vmem:[%s7436_s4 + $0x18] sm:$0xff] }
 0x522   :  { %v6552_v17 = vpack.c.bf16 %v5622_v14, %v5621_v11 }
 0x524   :  { %v5116_v18 = vpop.f32.mrb[54].mxu1  ;;  %6553 = vmatprep.subr.bf16.mxu0 %v6552_v17 }
 0x525   :  { %v5559_v21 = vsel %vm83_vm1, %v5116_v18, 0.0  ;;  %v5189_v24 = vpop.f32.mrb[60].mxu0  ;;  %v6487_v25 = vpop.f32.mrb[55].mxu1  ;;  %6555 = vmatpush3.bf16.msra.mxu0 %v6552_v17  ;;  %v5710_v18 = vld [vmem:[%s7437_s5] sm:$0xff] }
 0x526   :  { %v5560_v27 = vadd.f32 %v5559_v21, %v5558_v20  ;;  %v6492_v28 = vpop.f32.mrb[61].mxu0  ;;  %v5561_v29 = vsel %vm83_vm1, %v5189_v24, 0.0  ;;  %v5711_v20 = vld [vmem:[%s7437_s5 + $0x8] sm:$0xff]  ;;  %v5712_v21 = vld [vmem:[%s7437_s5 + $0x10] sm:$0xff]  ;;  %v5713_v25 = vld [vmem:[%s7437_s5 + $0x18] sm:$0xff] }
 0x527   :  { %v6556_v24 = vpack.c.bf16 %v5711_v20, %v5710_v18  ;;  %v5714_v28 = vld [vmem:[%s7437_s5 + $0x20] sm:$0xff] }
 0x528   :  { %v5562_v31 = vadd.f32 %v5561_v29, %v5560_v27  ;;  %v5262_v32 = vpop.f32.mrb[56].mxu1  ;;  %v6560_v27 = vpack.c.bf16 %v5713_v25, %v5712_v21  ;;  %v5715_v29 = vld [vmem:[%s7437_s5 + $0x28] sm:$0xff] }
 0x529   :  { %v5563_v0 = vsel %vm83_vm1, %v5262_v32, 0.0  ;;  %v5335_v33 = vpop.f32.mrb[62].mxu0  ;;  %v6497_v34 = vpop.f32.mrb[57].mxu1  ;;  %6557 = vmatprep.subr.bf16.mxu1 %v6556_v24 }
 0x52a   :  { %v5564_v35 = vadd.f32 %v5563_v0, %v5562_v31  ;;  %v6502_v36 = vpop.f32.mrb[63].mxu0  ;;  %v5565_v40 = vsel %vm83_vm1, %v5335_v33, 0.0  ;;  %6559 = vmatpush3.bf16.msra.mxu1 %v6556_v24  ;;  %v6564_v31 = vpack.c.bf16 %v5715_v29, %v5714_v28 }
 0x52b   :  { %6561 = vmatprep.subr.bf16.mxu1 %v6560_v27 }
 0x52c   :  { %v5408_v37 = vpop.f32.mrb[58].mxu1  ;;  %v5572_v39 = vadd.f32 %v6640_v38, %v5564_v35  ;;  %v5717_v38 = vld [vmem:[%s7437_s5 + $0x38] sm:$0xff] }
 0x52d   :  { %v5566_v41 = vsel %vm83_vm1, %v5408_v37, 0.0  ;;  %v5481_v42 = vpop.f32.mrb[64].mxu0  ;;  %v6507_v43 = vpop.f32.mrb[59].mxu1  ;;  %v5716_v37 = vld [vmem:[%s7437_s5 + $0x30] sm:$0xff]  ;;  %s6747_s5 = smov [#allocation8]  }
 0x52e   :  { %v5567_v44 = vadd.f32 %v5566_v41, %v5565_v40  ;;  %v6512_v47 = vpop.f32.mrb[65].mxu0  ;;  %v5575_v48 = vsel %vm83_vm1, %v5572_v39, 0.0  ;;  %v5568_v51 = vsel %vm83_vm1, %v5481_v42, 0.0  ;;  %6563 = vmatpush3.bf16.msra.mxu1 %v6560_v27  ;;  %v5623_v40 = vlaneseq  ;;  %v5618_v43 = vld [vmem:[%s7438_s6] sm:$0x3]  ;;  %s5853_s6 = sshll.u32 %s6747_s5, 4  ;;  %s5854_s6 = int_to_ptr.vmem [resolvable:$true] %s5853_s6 }
 0x52f   :  { %5576 = vadd.xlane.f32.xlu0 %v5575_v48  ;;  %6565 = vmatprep.subr.bf16.mxu1 %v6564_v31  ;;  %s6708_s15 = scalar_lea.vmem %s5854_s6, 256  ;;  %p6713_p11 = scmp.lt.s32.totalorder %s5854_s6, %s5854_s6 }
 0x530   :  { %v5569_v52 = vadd.f32 %v5568_v51, %v5567_v44  ;;  %v5554_v55 = vpop.f32.mrb[60].mxu1  ;;  %v5624_v41 = vshrl.u32 %v5623_v40, 7  ;;  %p6709_p10 = scmp.ne.s32.totalorder %s5854_s6, %s6708_s15  ;;  %p6714_p12 = scmp.lt.s32.totalorder %s6708_s15, %s6708_s15 }
 0x531   :  { %v5570_v56 = vsel %vm83_vm1, %v5554_v55, 0.0  ;;  %v6517_v59 = vpop.f32.mrb[61].mxu1 }
 0x532   :  { %v5571_v60 = vadd.f32 %v5570_v56, %v5569_v52  ;;  %6567 = vmatpush3.bf16.msra.mxu1 %v6564_v31  ;;  %v5625_v42 = vsub.s32 0, %v5624_v41  ;;  %v5720_v59 = vsub.s32 1, %v5624_v41  ;;  %p6715_p13 = por %p6714_p12, %p6713_p11 }
 0x534   :  { %v5573_v63 = vadd.f32 %v6641_v22, %v5571_v60  ;;  %v5626_v44 = vrot.slane %v5618_v43, %v5625_v42  ;;  %v5721_v60 = vrot.slane %v5618_v43, %v5720_v59  ;;  %p6716_p0 = pnand %p6715_p13, %p6709_p10 }
 0x536   :  { %v5578_v15 = vsel %vm83_vm1, %v5573_v63, 0.0 }
 0x537   :  { %5579 = vadd.xlane.f32.xlu1 %v5578_v15 }
 0x5bc   :  { %v5577_v26 = vpop.xlane.xlu0 %5576 }
 0x5bd   :  { %v5582_v4 = vmul.f32 0.03125, %v5577_v26 }
 0x5c4   :  { %v5580_v1 = vpop.xlane.xlu1 %5579 }
 0x5c5   :  { %v5583_v19 = vmul.f32 0.03125, %v5580_v1 }
 0x5c7   :  { %v5584_v30 = vadd.f32 %v5583_v19, %v5582_v4 }
 0x5c9   :  { %v5586_v5 = vmul.f32 0.5, %v5584_v30 }
 0x5cb   :  { %v5588_v23 = vsub.f32 %v5573_v63, %v5586_v5  ;;  %v5587_v8 = vsub.f32 %v5572_v39, %v5586_v5  ;;  %v6568_v39 = vpack.c.bf16 %v5717_v38, %v5716_v37 }
 0x5cd   :  { %v5590_v9 = vmul.f32 %v5588_v23, %v5588_v23  ;;  %v5589_v12 = vmul.f32 %v5587_v8, %v5587_v8  ;;  %6569 = vmatprep.subr.bf16.mxu1 %v6568_v39 }
 0x5ce   :  { %6571 = vmatpush3.bf16.msra.mxu1 %v6568_v39 }
 0x5cf   :  { %v5594_v13 = vsel %vm83_vm1, %v5590_v9, 0.0  ;;  %v5591_v16 = vsel %vm83_vm1, %v5589_v12, 0.0 }
 0x5d0   :  { %5595 = vadd.xlane.f32.xlu1 %v5594_v13  ;;  %5592 = vadd.xlane.f32.xlu0 %v5591_v16 }
 0x5e1   :  { %5613 = vperm.xlu1 %6601, %v7370_v50  }
 0x65d   :  { %v5596_v57 = vpop.xlane.xlu1 %5595  ;;  %v5593_v58 = vpop.xlane.xlu0 %5592 }
 0x65e   :  { %v5598_v62 = vmul.f32 0.03125, %v5596_v57  ;;  %v5597_v61 = vmul.f32 0.03125, %v5593_v58  ;;  %v6745_v57 = vmov 2   ;;  %v6746_v58 = vmov 3  }
 0x65f   :  { %6602 = vset.pattern.permute.xlu1 %v6745_v57 }
 0x660   :  { %v5599_v2 = vadd.f32 %v5598_v62, %v5597_v61 }
 0x661   :  { %v5614_v0 = vpop.permute.xlu1 %5613 }
 0x662   :  { %v5600_v3 = vmul.f32 0.5, %v5599_v2 }
 0x664   :  { %v5601_v6 = vadd.f32 1e-05, %v5600_v3 }
 0x666   :  { %6636 = vrsqrt.f32 %v5601_v6 }
 0x670   :  { %v6637_v7 = vpop.eup %6636 }
 0x671   :  { %v5603_v10 = vmul.f32 %v6637_v7, %v7370_v50 }
 0x673   :  { %5606 = vperm.xlu0 %6600, %v5603_v10  }
 0x677   :  { %6603 = vset.pattern.permute.xlu0 %v6746_v58 }
 0x6f2   :  { %v5607_v32 = vpop.permute.xlu0 %5606 }
 0x6f3   :  { %v5609_v33 = vmul.f32 %v5607_v32, %v5587_v8  ;;  %v5610_v34 = vmul.f32 %v5607_v32, %v5588_v23 }
 0x6f5   :  { %v5616_v35 = vadd.f32 %v5614_v0, %v5609_v33  ;;  %v5617_v36 = vadd.f32 %v5614_v0, %v5610_v34 }
 0x6f7   :  { %6526 = vmatprep.mubr.msk.f32.mxu0 %vm83_vm1, %v5616_v35 }
 0x6f8   :  { %6527 = vmatmul.mubr.msk.f32.vlgmr.msra.gmra.mrb[66].mxu0 %vm83_vm1, %v5617_v36 }
 0x7cb   :  { %v6528_v47 = vpop.f32.mrb[66].mxu0 }
 0x7cc   :  { %v5705_v48 = vadd.f32 %v6528_v47, %v5626_v44  ;;  %v5699_v51 = vpop.f32.mrb[67].mxu0 }
 0x7cd   :  { %v5700_v52 = vadd.f32 %v5699_v51, %v5626_v44 }
 0x7ce   :  { %v5709_v56 = vmax.f32 %v5705_v48, 0.0 }
 0x7cf   :  { %v5708_v55 = vmax.f32 %v5700_v52, 0.0 }
 0x7d1   :  { %6545 = vmatprep.mubr.msk.f32.mxu1 %vm5722_vm3, %v5708_v55 }
 0x7d2   :  { %6546 = vmatmul.mubr.msk.f32.vlgmr.msra.gmra.mrb[62].mxu1 %vm5722_vm3, %v5709_v56 }
 0x8a5   :  { %v6547_v22 = vpop.f32.mrb[62].mxu1 }
 0x8a6   :  { %v5801_v63 = vadd.f32 %v6547_v22, %v5721_v60  ;;  %v5795_v15 = vpop.f32.mrb[63].mxu1 }
 0x8a7   :  { %v5796_v26 = vadd.f32 %v5795_v15, %v5721_v60 }
 0x8a8   :  { %v5805_v1 = vadd.f32 %v5801_v63, %v5617_v36 }
 0x8a9   :  { %v5804_v4 = vadd.f32 %v5796_v26, %v5616_v35 }
 0x8aa   :  { %v5809_v19 = vsel %vm83_vm1, %v5805_v1, 0.0 }
 0x8ab   :  { %5810 = vadd.xlane.f32.xlu0 %v5809_v19  ;;  %v5806_v30 = vsel %vm83_vm1, %v5804_v4, 0.0 }
 0x8ac   :  { %5807 = vadd.xlane.f32.xlu1 %v5806_v30 }
 0x8c1   :  { %5841 = vperm.xlu0 %6603, %v7370_v50  }
 0x938   :  { %v5811_v5 = vpop.xlane.xlu0 %5810 }
 0x939   :  { %v5813_v23 = vmul.f32 0.03125, %v5811_v5  ;;  %v5808_v8 = vpop.xlane.xlu1 %5807 }
 0x93a   :  { %v5812_v9 = vmul.f32 0.03125, %v5808_v8 }
 0x93c   :  { %v5814_v12 = vadd.f32 %v5813_v23, %v5812_v9 }
 0x93e   :  { %v5815_v13 = vmul.f32 0.5, %v5814_v12 }
 0x940   :  { %v5816_v16 = vsub.f32 %v5804_v4, %v5815_v13  ;;  %v5817_v45 = vsub.f32 %v5805_v1, %v5815_v13  ;;  %v5842_v18 = vpop.permute.xlu0 %5841 }
 0x942   :  { %v5818_v46 = vmul.f32 %v5816_v16, %v5816_v16  ;;  %v5819_v53 = vmul.f32 %v5817_v45, %v5817_v45 }
 0x944   :  { %v5820_v49 = vsel %vm83_vm1, %v5818_v46, 0.0  ;;  %v5823_v54 = vsel %vm83_vm1, %v5819_v53, 0.0 }
 0x945   :  { %5821 = vadd.xlane.f32.xlu1 %v5820_v49 }
 0x949   :  { %5824 = vadd.xlane.f32.xlu1 %v5823_v54 }
 0x9d2   :  { %v5822_v62 = vpop.xlane.xlu1 %5821 }
 0x9d3   :  { %v5826_v2 = vmul.f32 0.03125, %v5822_v62 }
 0x9d6   :  { %v5825_v61 = vpop.xlane.xlu1 %5824 }
 0x9d7   :  { %v5827_v3 = vmul.f32 0.03125, %v5825_v61 }
 0x9d9   :  { %v5828_v6 = vadd.f32 %v5827_v3, %v5826_v2 }
 0x9db   :  { %v5829_v7 = vmul.f32 0.5, %v5828_v6 }
 0x9dd   :  { %v5830_v10 = vadd.f32 1e-05, %v5829_v7 }
 0x9df   :  { %6638 = vrsqrt.f32 %v5830_v10 }
 0x9e9   :  { %v6639_v11 = vpop.eup %6638 }
 0x9ea   :  { %v5832_v14 = vmul.f32 %v6639_v11, %v7370_v50 }
 0x9ec   :  { %5835 = vperm.xlu1 %6602, %v5832_v14  }
 0xa6b   :  { %v5836_v17 = vpop.permute.xlu1 %5835 }
 0xa6c   :  { %v5838_v20 = vmul.f32 %v5836_v17, %v5816_v16  ;;  %v5839_v21 = vmul.f32 %v5836_v17, %v5817_v45 }
 0xa6e   :  { %v5844_v24 = vadd.f32 %v5842_v18, %v5838_v20  ;;  %v5845_v25 = vadd.f32 %v5842_v18, %v5839_v21 }
 0xa70   :  { %5846 = vst.msk [vmem:[#allocation8] sm:$0xff] %vm83_vm1, %v5844_v24  ;;  %5847 = vst.msk [vmem:[#allocation8 + $0x8] sm:$0xff] %vm83_vm1, %v5845_v25 }
 0xa71   :  { %6719 = shalt.err (!%p6716_p0)
}
 0xa72   :  { %s6720_s20 = scalar_lea.hbm %s7440_s8, 256 }
 0xa73   :  { %p6721_p1 = scmp.ne.s32.totalorder %s7440_s8, %s6720_s20  ;;  %p6724_p2 = scmp.lt.u32.totalorder %s6720_s20, %s7440_s8 }
 0xa75   :  { %p6726_p3 = pnand %p6724_p2, %p6721_p1 }
 0xa77   :  { %6729 = shalt.err (!%p6726_p3)
}
 0xa78   :  { %5859 = dma.vmem_to_hbm [thread:$0]  %s5854_s6, 256, %s7440_s8, [#allocation4], %s6738_s17, %s6738_s17, %s6739_s18  }
 0xa79   :  { %6734 = dma.done.wait [#allocation4], 256  }
 0xa7a   :  { %6735 = vsyncadd [#allocation4], 4294967040 }
 0xa7b   :  { %5863 = vsyncpa [#allocation3], 1 }
 0xa7c   :  { %5864 = vsyncpa [#allocation6], 1 }
 0xa7d   :  { %5865 = vsyncpa [#allocation4], 1 }

</bundles_post_ra>
